<compile_context>
chip_gen: v6e
topology: v6e:2x2x1
jax: 0.10.0
libtpu: 0.0.40
codegen_flags: <defaults>
</compile_context>

<pallas_src>
import functools

import numpy as np
import jax
import jax.numpy as jnp
from jax.experimental import pallas as pl
from jax.experimental.pallas import tpu as pltpu


def _roi_align_kernel(gb_ref, rois_ref, phr_ref, pwr_ref, hq_ref, wq_ref,
                      x_ref, o_ref, wyx_sc, *, PH, PW, SR, R, H, W,
                      spatial_scale, aligned):
    """One grid step: R rois (same image) x TILE_C channels."""
    del gb_ref                      # only used inside the index_maps
    g = pl.program_id(1)            # roi-group index (inner, fastest axis)
    PHW = PH * PW
    HW = H * W

    ph = phr_ref[...]               # (PHW, 1)  ph of output row
    pw = pwr_ref[...]               # (PHW, 1)  pw of output row
    hq = hq_ref[...]                # (1, HW)   h of feature column
    wq = wq_ref[...]                # (1, HW)   w of feature column

    offset = 0.5 if aligned else 0.0
    inv_sr = 1.0 / float(SR)        # 1/SR folded into vy and vx -> 1/(SR*SR)

    # Build R stacked (PHW, HW) bilinear weight blocks in f32.  The roi group
    # is the fast grid axis, so there is nothing to cache across steps.
    for r in range(R):
        s = g * R + r               # slot index into the (5, SLOTS) roi table
        start_w = rois_ref[1, s] * spatial_scale - offset
        start_h = rois_ref[2, s] * spatial_scale - offset
        end_w = rois_ref[3, s] * spatial_scale - offset
        end_h = rois_ref[4, s] * spatial_scale - offset
        roi_w = end_w - start_w
        roi_h = end_h - start_h
        if not aligned:             # legacy behavior: force rois to be >= 1x1
            roi_w = jnp.maximum(roi_w, 1.0)
            roi_h = jnp.maximum(roi_h, 1.0)
        bin_h = roi_h / float(PH)
        bin_w = roi_w / float(PW)

        # Wy[r_out, q] = sum_iy (1/SR) * valid(y) * max(0, 1 - |clip(y) - h(q)|)
        wy = jnp.zeros((PHW, HW), jnp.float32)
        for iy in range(SR):
            y = start_h + ph * bin_h + (iy + 0.5) * (bin_h * inv_sr)
            vy = jnp.where((y >= -1.0) & (y <= float(H)), inv_sr, 0.0)
            yc = jnp.clip(y, 0.0, float(H - 1))
            wy = wy + jnp.maximum(0.0, 1.0 - jnp.abs(yc - hq)) * vy
        wx = jnp.zeros((PHW, HW), jnp.float32)
        for ix in range(SR):
            xs = start_w + pw * bin_w + (ix + 0.5) * (bin_w * inv_sr)
            vx = jnp.where((xs >= -1.0) & (xs <= float(W)), inv_sr, 0.0)
            xc = jnp.clip(xs, 0.0, float(W - 1))
            wx = wx + jnp.maximum(0.0, 1.0 - jnp.abs(xc - wq)) * vx

        wyx_sc[r * PHW:(r + 1) * PHW, :] = wy * wx

    # One MXU matmul for all R rois of this group: (R*PHW, HW) @ (HW, TILE_C).
    feat = x_ref[0]                 # (HW, TILE_C)
    if feat.dtype != jnp.float32:
        feat = feat.astype(jnp.float32)
    out = jnp.dot(wyx_sc[...], feat, preferred_element_type=jnp.float32)
    o_ref[...] = out.reshape(R, PHW, feat.shape[-1]).astype(o_ref.dtype)


def _pick_tile_c(c_pad, hw, itemsize, budget):
    """Largest 128-multiple dividing c_pad whose slab fits the VMEM budget."""
    best = 128
    tc = 128
    while tc <= c_pad:
        if c_pad % tc == 0 and hw * tc * itemsize <= budget:
            best = tc
        tc += 128
    return best


def roi_align_pallas(x, rois, output_size, spatial_scale=1.0,
                     sampling_ratio=-1, aligned=False, channels_last=False):
    """Pallas TPU RoIAlign.  x: (N, C, H, W) (or (N, H, W, C) if
    channels_last=True); rois: (K, 5) -> (K, C, PH, PW)."""
    if isinstance(output_size, (tuple, list)):
        PH, PW = int(output_size[0]), int(output_size[1])
    else:
        PH = PW = int(output_size)
    if sampling_ratio <= 0:
        raise NotImplementedError("sampling_ratio must be > 0 in this kernel")
    SR = int(sampling_ratio)

    if channels_last:
        N, H, W, C = x.shape
        x_nhwc = x
    else:
        N, C, H, W = x.shape
        x_nhwc = jnp.transpose(x, (0, 2, 3, 1))
    K = rois.shape[0]
    PHW, HW = PH * PW, H * W
    itemsize = jnp.dtype(x.dtype).itemsize

    # ---- lane-dense channel padding (multiple of 128) -----------------------
    C_pad = -(-C // 128) * 128
    x_flat = x_nhwc.reshape(N, HW, C)
    if C_pad != C:
        x_flat = jnp.pad(x_flat, ((0, 0), (0, 0), (0, C_pad - C)))

    # ---- generation-aware VMEM budget ---------------------------------------
    try:
        vmem_cap = int(pltpu.get_tpu_info().vmem_capacity_bytes)
    except Exception:
        vmem_cap = 64 << 20          # conservative (v7x) fallback
    budget = vmem_cap // 5           # per feature-slab buffer (double-buffered)
    TILE_C = _pick_tile_c(C_pad, HW, itemsize, budget)
    C_blocks = C_pad // TILE_C

    # ---- roi grouping: sort by batch index, batch R rois per step -----------
    target_m = 256                   # MXU rows on v6e/v7x (2 passes on v5e)
    r_fill = max(1, target_m // PHW)
    r_avg = -(-K // max(N, 1))       # no point batching beyond avg rois/image
    R = max(1, min(r_fill, r_avg))

    bidx = jnp.clip(rois[:, 0].astype(jnp.int32), 0, N - 1)
    order = jnp.argsort(bidx)                       # sorted-position -> original roi
    sorted_b = bidx[order]
    first = jnp.searchsorted(sorted_b, sorted_b, side='left')
    pos = jnp.arange(K, dtype=jnp.int32) - first.astype(jnp.int32)
    cnt = jnp.bincount(bidx, length=N)              # rois per image
    gpb = (cnt + R - 1) // R                        # groups per image
    g_base = (jnp.cumsum(gpb) - gpb).astype(jnp.int32)
    slot = (g_base[sorted_b] * R + pos).astype(jnp.int32)

    # Static upper bound on group count (each nonempty image wastes <= R-1 slots).
    NG = int(-(-(K + min(N, K) * (R - 1)) // R))
    SLOTS = NG * R
    # Padding / unused slots fall back to roi 0 (valid; their output is dropped);
    # unused trailing groups keep the last image resident (no extra DMA).
    slot_to_roi = jnp.zeros((SLOTS,), jnp.int32).at[slot].set(order.astype(jnp.int32))
    group_batch = jnp.full((NG,), sorted_b[K - 1], jnp.int32).at[slot // R].set(sorted_b)
    slot_of = jnp.zeros((K,), jnp.int32).at[order].set(slot)

    rois_slots_t = jnp.transpose(rois.astype(jnp.float32)[slot_to_roi])  # (5, SLOTS)

    # Static index tables: output row r -> (ph, pw); feature column q -> (h, w).
    ph_r = jnp.asarray(np.repeat(np.arange(PH, dtype=np.float32), PW).reshape(PHW, 1))
    pw_r = jnp.asarray(np.tile(np.arange(PW, dtype=np.float32), PH).reshape(PHW, 1))
    h_q = jnp.asarray(np.repeat(np.arange(H, dtype=np.float32), W).reshape(1, HW))
    w_q = jnp.asarray(np.tile(np.arange(W, dtype=np.float32), H).reshape(1, HW))

    kernel = functools.partial(
        _roi_align_kernel, PH=PH, PW=PW, SR=SR, R=R, H=H, W=W,
        spatial_scale=float(spatial_scale), aligned=bool(aligned))

    grid_spec = pltpu.PrefetchScalarGridSpec(
        num_scalar_prefetch=1,
        grid=(C_blocks, NG),                         # roi groups innermost
        in_specs=[
            # slot-ordered roi table (5, SLOTS) in SMEM for scalar reads
            pl.BlockSpec(memory_space=pltpu.MemorySpace.SMEM),
            pl.BlockSpec((PHW, 1), lambda cb, g, gb: (0, 0)),       # ph of row
            pl.BlockSpec((PHW, 1), lambda cb, g, gb: (0, 0)),       # pw of row
            pl.BlockSpec((1, HW), lambda cb, g, gb: (0, 0)),        # h of col
            pl.BlockSpec((1, HW), lambda cb, g, gb: (0, 0)),        # w of col
            # (H*W, TILE_C) slab of the group's image; unchanged block index
            # across consecutive same-image groups -> DMA skipped (reuse).
            pl.BlockSpec((1, HW, TILE_C), lambda cb, g, gb: (gb[g], 0, cb)),
        ],
        out_specs=pl.BlockSpec((R, PHW, TILE_C), lambda cb, g, gb: (g, 0, cb)),
        scratch_shapes=[pltpu.VMEM((R * PHW, HW), jnp.float32)],    # stacked Wyx
    )

    need = (2 * (HW * TILE_C + R * PHW * TILE_C) * itemsize
            + R * PHW * HW * 4 + 2 * (2 * PHW + 2 * HW) * 4 + (4 << 20))
    vmem_limit = int(min(max(need, 32 << 20), (3 * vmem_cap) // 4))

    out_slots = pl.pallas_call(
        kernel,
        out_shape=jax.ShapeDtypeStruct((SLOTS, PHW, C_pad), x.dtype),
        grid_spec=grid_spec,
        compiler_params=pltpu.CompilerParams(
            dimension_semantics=("parallel", "arbitrary"),  # split channels across TCs
            vmem_limit_bytes=vmem_limit),
    )(group_batch, rois_slots_t, ph_r, pw_r, h_q, w_q, x_flat)

    # Gather back to original roi order, drop channel padding, go to NCHW.
    out = out_slots[slot_of][:, :, :C]                     # (K, PH*PW, C)
    return jnp.transpose(out.reshape(K, PH, PW, C), (0, 3, 1, 2))


def convert_boxes_to_roi_format(boxes):
    """List of (Ki, 4) box arrays -> (K, 5) rois [batch_idx, x1, y1, x2, y2]."""
    concat = jnp.concatenate(list(boxes), axis=0)
    ids = jnp.concatenate(
        [jnp.full((b.shape[0], 1), i, concat.dtype) for i, b in enumerate(boxes)],
        axis=0)
    return jnp.concatenate([ids, concat], axis=1)


class RoIAlign:
    """Mirror of torchvision.ops.RoIAlign (forward only)."""

    def __init__(self, output_size, spatial_scale, sampling_ratio, aligned=False):
        self.output_size = output_size
        self.spatial_scale = spatial_scale
        self.sampling_ratio = sampling_ratio
        self.aligned = aligned

    def __call__(self, input, rois):
        if isinstance(rois, (list, tuple)):
            rois = convert_boxes_to_roi_format(rois)
        return roi_align_pallas(input, rois, self.output_size, self.spatial_scale,
                                self.sampling_ratio, self.aligned)


def _roi_align_ref(x, rois, out_h, out_w, spatial_scale, sampling_ratio, aligned):
    """NumPy port of the torchvision CPU roi_align kernel (forward)."""
    x = np.asarray(x, np.float32)
    rois = np.asarray(rois, np.float32)
    K = rois.shape[0]
    N, C, H, W = x.shape
    out = np.zeros((K, C, out_h, out_w), np.float32)
    offset = 0.5 if aligned else 0.0
    for k in range(K):
        b = int(rois[k, 0])
        sw = rois[k, 1] * spatial_scale - offset
        sh = rois[k, 2] * spatial_scale - offset
        ew = rois[k, 3] * spatial_scale - offset
        eh = rois[k, 4] * spatial_scale - offset
        rw, rh = ew - sw, eh - sh
        if not aligned:
            rw, rh = max(rw, 1.0), max(rh, 1.0)
        bh, bw = rh / out_h, rw / out_w
        gh = sampling_ratio if sampling_ratio > 0 else int(np.ceil(rh / out_h))
        gw = sampling_ratio if sampling_ratio > 0 else int(np.ceil(rw / out_w))
        count = max(gh * gw, 1)
        for ph in range(out_h):
            for pw in range(out_w):
                acc = np.zeros((C,), np.float32)
                for iy in range(gh):
                    y = sh + ph * bh + (iy + 0.5) * bh / gh
                    for ix in range(gw):
                        xx = sw + pw * bw + (ix + 0.5) * bw / gw
                        if y < -1.0 or y > H or xx < -1.0 or xx > W:
                            continue
                        yy = min(max(y, 0.0), float(H - 1))
                        xc = min(max(xx, 0.0), float(W - 1))
                        y0, x0 = int(np.floor(yy)), int(np.floor(xc))
                        y1, x1 = min(y0 + 1, H - 1), min(x0 + 1, W - 1)
                        ly, lx = yy - y0, xc - x0
                        hy, hx = 1.0 - ly, 1.0 - lx
                        acc += (hy * hx * x[b, :, y0, x0] + hy * lx * x[b, :, y0, x1]
                                + ly * hx * x[b, :, y1, x0] + ly * lx * x[b, :, y1, x1])
                out[k, :, ph, pw] = acc / count
    return out


if __name__ == "__main__":
    key = jax.random.PRNGKey(0)
    x = jax.random.normal(key, (2, 4, 16, 16), jnp.float32)   # (N, C, H, W)

    # rois: [batch_idx, x1, y1, x2, y2] in input-image coords (scale 0.5 -> 32x32)
    rois = jnp.array([
        [0.0,  2.0,  3.0, 20.0, 24.0],
        [1.0,  0.0,  0.0, 31.0, 31.0],
        [0.0, 10.5,  6.25, 18.75, 30.0],
        [1.0, -4.0, -6.0, 40.0, 38.0],    # partially out of bounds
    ], jnp.float32)

    configs = [
        dict(output_size=(4, 4), spatial_scale=0.5, sampling_ratio=2, aligned=True),
        dict(output_size=(4, 4), spatial_scale=0.5, sampling_ratio=3, aligned=False),
    ]
    for cfg in configs:
        op = RoIAlign(cfg["output_size"], cfg["spatial_scale"],
                      cfg["sampling_ratio"], cfg["aligned"])
        out = op(x, rois)
        out = jax.block_until_ready(out)
        ref = _roi_align_ref(np.asarray(x), np.asarray(rois),
                             cfg["output_size"][0], cfg["output_size"][1],
                             cfg["spatial_scale"], cfg["sampling_ratio"], cfg["aligned"])
        np.testing.assert_allclose(np.asarray(out), ref, rtol=1e-4, atol=1e-4)

    print("KERNEL_OK")
</pallas_src>

<mosaic_0001>
module attributes {stable_mosaic.version = 11 : i64} {
  func.func @_roi_align_kernel(%arg0: i32, %arg1: i32, %arg2: memref<3xi32, #tpu.memory_space<smem>>, %arg3: memref<5x6xf32, #tpu.memory_space<smem>>, %arg4: memref<16x1xf32, #tpu.memory_space<vmem>>, %arg5: memref<16x1xf32, #tpu.memory_space<vmem>>, %arg6: memref<1x256xf32, #tpu.memory_space<vmem>>, %arg7: memref<1x256xf32, #tpu.memory_space<vmem>>, %arg8: memref<1x256x128xf32, #tpu.memory_space<vmem>>, %arg9: memref<2x16x128xf32, #tpu.memory_space<vmem>>, %arg10: memref<32x256xf32, #tpu.memory_space<vmem>>) attributes {dimension_semantics = [#tpu.dimension_semantics<parallel>, #tpu.dimension_semantics<arbitrary>], iteration_bounds = array<i64: 1, 3>, scalar_prefetch = 1 : i64, scratch_operands = 1 : i64, tpu.core_type = #tpu.core_type<tc>, window_params = [{transform_indices = @transform_0, window_bounds = array<i64: 5, 6>}, {pipeline_mode = #tpu.pipeline_mode<synchronous>, transform_indices = @transform_1, window_bounds = array<i64: 16, 1>}, {pipeline_mode = #tpu.pipeline_mode<synchronous>, transform_indices = @transform_2, window_bounds = array<i64: 16, 1>}, {pipeline_mode = #tpu.pipeline_mode<synchronous>, transform_indices = @transform_3, window_bounds = array<i64: 1, 256>}, {pipeline_mode = #tpu.pipeline_mode<synchronous>, transform_indices = @transform_4, window_bounds = array<i64: 1, 256>}, {transform_indices = @transform_5, window_bounds = array<i64: 1, 256, 128>}, {transform_indices = @transform_6, window_bounds = array<i64: 2, 16, 128>}]} {
    %c0 = arith.constant 0 : index
    %c0_0 = arith.constant 0 : index
    %0 = vector.load %arg4[%c0, %c0_0] : memref<16x1xf32, #tpu.memory_space<vmem>>, vector<16x1xf32>
    %c0_1 = arith.constant 0 : index
    %c0_2 = arith.constant 0 : index
    %1 = vector.load %arg5[%c0_1, %c0_2] : memref<16x1xf32, #tpu.memory_space<vmem>>, vector<16x1xf32>
    %c0_3 = arith.constant 0 : index
    %c0_4 = arith.constant 0 : index
    %2 = vector.load %arg6[%c0_3, %c0_4] : memref<1x256xf32, #tpu.memory_space<vmem>>, vector<1x256xf32>
    %c0_5 = arith.constant 0 : index
    %c0_6 = arith.constant 0 : index
    %3 = vector.load %arg7[%c0_5, %c0_6] : memref<1x256xf32, #tpu.memory_space<vmem>>, vector<1x256xf32>
    %c2_i32 = arith.constant 2 : i32
    %4 = arith.muli %arg1, %c2_i32 : i32
    %c0_i32 = arith.constant 0 : i32
    %5 = arith.addi %4, %c0_i32 : i32
    %c1 = arith.constant 1 : index
    %6 = arith.index_cast %5 : i32 to index
    %7 = memref.load %arg3[%c1, %6] : memref<5x6xf32, #tpu.memory_space<smem>>
    %cst = arith.constant 5.000000e-01 : f32
    %8 = arith.mulf %7, %cst : f32
    %cst_7 = arith.constant 5.000000e-01 : f32
    %9 = arith.subf %8, %cst_7 : f32
    %c2 = arith.constant 2 : index
    %10 = arith.index_cast %5 : i32 to index
    %11 = memref.load %arg3[%c2, %10] : memref<5x6xf32, #tpu.memory_space<smem>>
    %cst_8 = arith.constant 5.000000e-01 : f32
    %12 = arith.mulf %11, %cst_8 : f32
    %cst_9 = arith.constant 5.000000e-01 : f32
    %13 = arith.subf %12, %cst_9 : f32
    %c3 = arith.constant 3 : index
    %14 = arith.index_cast %5 : i32 to index
    %15 = memref.load %arg3[%c3, %14] : memref<5x6xf32, #tpu.memory_space<smem>>
    %cst_10 = arith.constant 5.000000e-01 : f32
    %16 = arith.mulf %15, %cst_10 : f32
    %cst_11 = arith.constant 5.000000e-01 : f32
    %17 = arith.subf %16, %cst_11 : f32
    %c4 = arith.constant 4 : index
    %18 = arith.index_cast %5 : i32 to index
    %19 = memref.load %arg3[%c4, %18] : memref<5x6xf32, #tpu.memory_space<smem>>
    %cst_12 = arith.constant 5.000000e-01 : f32
    %20 = arith.mulf %19, %cst_12 : f32
    %cst_13 = arith.constant 5.000000e-01 : f32
    %21 = arith.subf %20, %cst_13 : f32
    %22 = arith.subf %17, %9 : f32
    %23 = arith.subf %21, %13 : f32
    %cst_14 = arith.constant 4.000000e+00 : f32
    %24 = arith.divf %23, %cst_14 : f32
    %cst_15 = arith.constant 4.000000e+00 : f32
    %25 = arith.divf %22, %cst_15 : f32
    %cst_16 = arith.constant 0.000000e+00 : f32
    %26 = vector.broadcast %cst_16 : f32 to vector<16x256xf32>
    %27 = vector.broadcast %24 : f32 to vector<16x1xf32>
    %28 = arith.mulf %0, %27 : vector<16x1xf32>
    %29 = vector.broadcast %13 : f32 to vector<16x1xf32>
    %30 = arith.addf %29, %28 : vector<16x1xf32>
    %cst_17 = arith.constant 5.000000e-01 : f32
    %31 = arith.mulf %24, %cst_17 : f32
    %cst_18 = arith.constant 5.000000e-01 : f32
    %32 = arith.mulf %cst_18, %31 : f32
    %33 = vector.broadcast %32 : f32 to vector<16x1xf32>
    %34 = arith.addf %30, %33 : vector<16x1xf32>
    %cst_19 = arith.constant -1.000000e+00 : f32
    %35 = vector.broadcast %cst_19 : f32 to vector<16x1xf32>
    %36 = arith.cmpf oge, %34, %35 : vector<16x1xf32>
    %cst_20 = arith.constant 1.600000e+01 : f32
    %37 = vector.broadcast %cst_20 : f32 to vector<16x1xf32>
    %38 = arith.cmpf ole, %34, %37 : vector<16x1xf32>
    %39 = arith.andi %36, %38 : vector<16x1xi1>
    %cst_21 = arith.constant 5.000000e-01 : f32
    %cst_22 = arith.constant 0.000000e+00 : f32
    %40 = vector.broadcast %cst_21 : f32 to vector<16x1xf32>
    %41 = vector.broadcast %cst_22 : f32 to vector<16x1xf32>
    %42 = arith.select %39, %40, %41 : vector<16x1xi1>, vector<16x1xf32>
    %cst_23 = arith.constant 0.000000e+00 : f32
    %cst_24 = arith.constant 1.500000e+01 : f32
    %43 = vector.broadcast %cst_23 : f32 to vector<16x1xf32>
    %44 = arith.maximumf %43, %34 : vector<16x1xf32>
    %45 = vector.broadcast %cst_24 : f32 to vector<16x1xf32>
    %46 = arith.minimumf %45, %44 : vector<16x1xf32>
    %47 = vector.broadcast %46 : vector<16x1xf32> to vector<16x256xf32>
    %48 = vector.broadcast %2 : vector<1x256xf32> to vector<16x256xf32>
    %49 = arith.subf %47, %48 : vector<16x256xf32>
    %50 = math.absf %49 : vector<16x256xf32>
    %cst_25 = arith.constant 1.000000e+00 : f32
    %51 = vector.broadcast %cst_25 : f32 to vector<16x256xf32>
    %52 = arith.subf %51, %50 : vector<16x256xf32>
    %cst_26 = arith.constant 0.000000e+00 : f32
    %53 = vector.broadcast %cst_26 : f32 to vector<16x256xf32>
    %54 = arith.maximumf %53, %52 : vector<16x256xf32>
    %55 = vector.broadcast %42 : vector<16x1xf32> to vector<16x256xf32>
    %56 = arith.mulf %54, %55 : vector<16x256xf32>
    %57 = arith.addf %26, %56 : vector<16x256xf32>
    %58 = vector.broadcast %24 : f32 to vector<16x1xf32>
    %59 = arith.mulf %0, %58 : vector<16x1xf32>
    %60 = vector.broadcast %13 : f32 to vector<16x1xf32>
    %61 = arith.addf %60, %59 : vector<16x1xf32>
    %cst_27 = arith.constant 5.000000e-01 : f32
    %62 = arith.mulf %24, %cst_27 : f32
    %cst_28 = arith.constant 1.500000e+00 : f32
    %63 = arith.mulf %cst_28, %62 : f32
    %64 = vector.broadcast %63 : f32 to vector<16x1xf32>
    %65 = arith.addf %61, %64 : vector<16x1xf32>
    %cst_29 = arith.constant -1.000000e+00 : f32
    %66 = vector.broadcast %cst_29 : f32 to vector<16x1xf32>
    %67 = arith.cmpf oge, %65, %66 : vector<16x1xf32>
    %cst_30 = arith.constant 1.600000e+01 : f32
    %68 = vector.broadcast %cst_30 : f32 to vector<16x1xf32>
    %69 = arith.cmpf ole, %65, %68 : vector<16x1xf32>
    %70 = arith.andi %67, %69 : vector<16x1xi1>
    %cst_31 = arith.constant 5.000000e-01 : f32
    %cst_32 = arith.constant 0.000000e+00 : f32
    %71 = vector.broadcast %cst_31 : f32 to vector<16x1xf32>
    %72 = vector.broadcast %cst_32 : f32 to vector<16x1xf32>
    %73 = arith.select %70, %71, %72 : vector<16x1xi1>, vector<16x1xf32>
    %cst_33 = arith.constant 0.000000e+00 : f32
    %cst_34 = arith.constant 1.500000e+01 : f32
    %74 = vector.broadcast %cst_33 : f32 to vector<16x1xf32>
    %75 = arith.maximumf %74, %65 : vector<16x1xf32>
    %76 = vector.broadcast %cst_34 : f32 to vector<16x1xf32>
    %77 = arith.minimumf %76, %75 : vector<16x1xf32>
    %78 = vector.broadcast %77 : vector<16x1xf32> to vector<16x256xf32>
    %79 = vector.broadcast %2 : vector<1x256xf32> to vector<16x256xf32>
    %80 = arith.subf %78, %79 : vector<16x256xf32>
    %81 = math.absf %80 : vector<16x256xf32>
    %cst_35 = arith.constant 1.000000e+00 : f32
    %82 = vector.broadcast %cst_35 : f32 to vector<16x256xf32>
    %83 = arith.subf %82, %81 : vector<16x256xf32>
    %cst_36 = arith.constant 0.000000e+00 : f32
    %84 = vector.broadcast %cst_36 : f32 to vector<16x256xf32>
    %85 = arith.maximumf %84, %83 : vector<16x256xf32>
    %86 = vector.broadcast %73 : vector<16x1xf32> to vector<16x256xf32>
    %87 = arith.mulf %85, %86 : vector<16x256xf32>
    %88 = arith.addf %57, %87 : vector<16x256xf32>
    %cst_37 = arith.constant 0.000000e+00 : f32
    %89 = vector.broadcast %cst_37 : f32 to vector<16x256xf32>
    %90 = vector.broadcast %25 : f32 to vector<16x1xf32>
    %91 = arith.mulf %1, %90 : vector<16x1xf32>
    %92 = vector.broadcast %9 : f32 to vector<16x1xf32>
    %93 = arith.addf %92, %91 : vector<16x1xf32>
    %cst_38 = arith.constant 5.000000e-01 : f32
    %94 = arith.mulf %25, %cst_38 : f32
    %cst_39 = arith.constant 5.000000e-01 : f32
    %95 = arith.mulf %cst_39, %94 : f32
    %96 = vector.broadcast %95 : f32 to vector<16x1xf32>
    %97 = arith.addf %93, %96 : vector<16x1xf32>
    %cst_40 = arith.constant -1.000000e+00 : f32
    %98 = vector.broadcast %cst_40 : f32 to vector<16x1xf32>
    %99 = arith.cmpf oge, %97, %98 : vector<16x1xf32>
    %cst_41 = arith.constant 1.600000e+01 : f32
    %100 = vector.broadcast %cst_41 : f32 to vector<16x1xf32>
    %101 = arith.cmpf ole, %97, %100 : vector<16x1xf32>
    %102 = arith.andi %99, %101 : vector<16x1xi1>
    %cst_42 = arith.constant 5.000000e-01 : f32
    %cst_43 = arith.constant 0.000000e+00 : f32
    %103 = vector.broadcast %cst_42 : f32 to vector<16x1xf32>
    %104 = vector.broadcast %cst_43 : f32 to vector<16x1xf32>
    %105 = arith.select %102, %103, %104 : vector<16x1xi1>, vector<16x1xf32>
    %cst_44 = arith.constant 0.000000e+00 : f32
    %cst_45 = arith.constant 1.500000e+01 : f32
    %106 = vector.broadcast %cst_44 : f32 to vector<16x1xf32>
    %107 = arith.maximumf %106, %97 : vector<16x1xf32>
    %108 = vector.broadcast %cst_45 : f32 to vector<16x1xf32>
    %109 = arith.minimumf %108, %107 : vector<16x1xf32>
    %110 = vector.broadcast %109 : vector<16x1xf32> to vector<16x256xf32>
    %111 = vector.broadcast %3 : vector<1x256xf32> to vector<16x256xf32>
    %112 = arith.subf %110, %111 : vector<16x256xf32>
    %113 = math.absf %112 : vector<16x256xf32>
    %cst_46 = arith.constant 1.000000e+00 : f32
    %114 = vector.broadcast %cst_46 : f32 to vector<16x256xf32>
    %115 = arith.subf %114, %113 : vector<16x256xf32>
    %cst_47 = arith.constant 0.000000e+00 : f32
    %116 = vector.broadcast %cst_47 : f32 to vector<16x256xf32>
    %117 = arith.maximumf %116, %115 : vector<16x256xf32>
    %118 = vector.broadcast %105 : vector<16x1xf32> to vector<16x256xf32>
    %119 = arith.mulf %117, %118 : vector<16x256xf32>
    %120 = arith.addf %89, %119 : vector<16x256xf32>
    %121 = vector.broadcast %25 : f32 to vector<16x1xf32>
    %122 = arith.mulf %1, %121 : vector<16x1xf32>
    %123 = vector.broadcast %9 : f32 to vector<16x1xf32>
    %124 = arith.addf %123, %122 : vector<16x1xf32>
    %cst_48 = arith.constant 5.000000e-01 : f32
    %125 = arith.mulf %25, %cst_48 : f32
    %cst_49 = arith.constant 1.500000e+00 : f32
    %126 = arith.mulf %cst_49, %125 : f32
    %127 = vector.broadcast %126 : f32 to vector<16x1xf32>
    %128 = arith.addf %124, %127 : vector<16x1xf32>
    %cst_50 = arith.constant -1.000000e+00 : f32
    %129 = vector.broadcast %cst_50 : f32 to vector<16x1xf32>
    %130 = arith.cmpf oge, %128, %129 : vector<16x1xf32>
    %cst_51 = arith.constant 1.600000e+01 : f32
    %131 = vector.broadcast %cst_51 : f32 to vector<16x1xf32>
    %132 = arith.cmpf ole, %128, %131 : vector<16x1xf32>
    %133 = arith.andi %130, %132 : vector<16x1xi1>
    %cst_52 = arith.constant 5.000000e-01 : f32
    %cst_53 = arith.constant 0.000000e+00 : f32
    %134 = vector.broadcast %cst_52 : f32 to vector<16x1xf32>
    %135 = vector.broadcast %cst_53 : f32 to vector<16x1xf32>
    %136 = arith.select %133, %134, %135 : vector<16x1xi1>, vector<16x1xf32>
    %cst_54 = arith.constant 0.000000e+00 : f32
    %cst_55 = arith.constant 1.500000e+01 : f32
    %137 = vector.broadcast %cst_54 : f32 to vector<16x1xf32>
    %138 = arith.maximumf %137, %128 : vector<16x1xf32>
    %139 = vector.broadcast %cst_55 : f32 to vector<16x1xf32>
    %140 = arith.minimumf %139, %138 : vector<16x1xf32>
    %141 = vector.broadcast %140 : vector<16x1xf32> to vector<16x256xf32>
    %142 = vector.broadcast %3 : vector<1x256xf32> to vector<16x256xf32>
    %143 = arith.subf %141, %142 : vector<16x256xf32>
    %144 = math.absf %143 : vector<16x256xf32>
    %cst_56 = arith.constant 1.000000e+00 : f32
    %145 = vector.broadcast %cst_56 : f32 to vector<16x256xf32>
    %146 = arith.subf %145, %144 : vector<16x256xf32>
    %cst_57 = arith.constant 0.000000e+00 : f32
    %147 = vector.broadcast %cst_57 : f32 to vector<16x256xf32>
    %148 = arith.maximumf %147, %146 : vector<16x256xf32>
    %149 = vector.broadcast %136 : vector<16x1xf32> to vector<16x256xf32>
    %150 = arith.mulf %148, %149 : vector<16x256xf32>
    %151 = arith.addf %120, %150 : vector<16x256xf32>
    %152 = arith.mulf %88, %151 : vector<16x256xf32>
    %c0_58 = arith.constant 0 : index
    %c0_59 = arith.constant 0 : index
    %153 = vector.load %arg10[%c0_58, %c0_59] : memref<32x256xf32, #tpu.memory_space<vmem>>, vector<16x256xf32>
    tpu.vector_store %arg10[%c0_58, %c0_59], %152 {strides = array<i32>} : memref<32x256xf32, #tpu.memory_space<vmem>>, vector<16x256xf32>,
    %c2_i32_60 = arith.constant 2 : i32
    %154 = arith.muli %arg1, %c2_i32_60 : i32
    %c1_i32 = arith.constant 1 : i32
    %155 = arith.addi %154, %c1_i32 : i32
    %c1_61 = arith.constant 1 : index
    %156 = arith.index_cast %155 : i32 to index
    %157 = memref.load %arg3[%c1_61, %156] : memref<5x6xf32, #tpu.memory_space<smem>>
    %cst_62 = arith.constant 5.000000e-01 : f32
    %158 = arith.mulf %157, %cst_62 : f32
    %cst_63 = arith.constant 5.000000e-01 : f32
    %159 = arith.subf %158, %cst_63 : f32
    %c2_64 = arith.constant 2 : index
    %160 = arith.index_cast %155 : i32 to index
    %161 = memref.load %arg3[%c2_64, %160] : memref<5x6xf32, #tpu.memory_space<smem>>
    %cst_65 = arith.constant 5.000000e-01 : f32
    %162 = arith.mulf %161, %cst_65 : f32
    %cst_66 = arith.constant 5.000000e-01 : f32
    %163 = arith.subf %162, %cst_66 : f32
    %c3_67 = arith.constant 3 : index
    %164 = arith.index_cast %155 : i32 to index
    %165 = memref.load %arg3[%c3_67, %164] : memref<5x6xf32, #tpu.memory_space<smem>>
    %cst_68 = arith.constant 5.000000e-01 : f32
    %166 = arith.mulf %165, %cst_68 : f32
    %cst_69 = arith.constant 5.000000e-01 : f32
    %167 = arith.subf %166, %cst_69 : f32
    %c4_70 = arith.constant 4 : index
    %168 = arith.index_cast %155 : i32 to index
    %169 = memref.load %arg3[%c4_70, %168] : memref<5x6xf32, #tpu.memory_space<smem>>
    %cst_71 = arith.constant 5.000000e-01 : f32
    %170 = arith.mulf %169, %cst_71 : f32
    %cst_72 = arith.constant 5.000000e-01 : f32
    %171 = arith.subf %170, %cst_72 : f32
    %172 = arith.subf %167, %159 : f32
    %173 = arith.subf %171, %163 : f32
    %cst_73 = arith.constant 4.000000e+00 : f32
    %174 = arith.divf %173, %cst_73 : f32
    %cst_74 = arith.constant 4.000000e+00 : f32
    %175 = arith.divf %172, %cst_74 : f32
    %cst_75 = arith.constant 0.000000e+00 : f32
    %176 = vector.broadcast %cst_75 : f32 to vector<16x256xf32>
    %177 = vector.broadcast %174 : f32 to vector<16x1xf32>
    %178 = arith.mulf %0, %177 : vector<16x1xf32>
    %179 = vector.broadcast %163 : f32 to vector<16x1xf32>
    %180 = arith.addf %179, %178 : vector<16x1xf32>
    %cst_76 = arith.constant 5.000000e-01 : f32
    %181 = arith.mulf %174, %cst_76 : f32
    %cst_77 = arith.constant 5.000000e-01 : f32
    %182 = arith.mulf %cst_77, %181 : f32
    %183 = vector.broadcast %182 : f32 to vector<16x1xf32>
    %184 = arith.addf %180, %183 : vector<16x1xf32>
    %cst_78 = arith.constant -1.000000e+00 : f32
    %185 = vector.broadcast %cst_78 : f32 to vector<16x1xf32>
    %186 = arith.cmpf oge, %184, %185 : vector<16x1xf32>
    %cst_79 = arith.constant 1.600000e+01 : f32
    %187 = vector.broadcast %cst_79 : f32 to vector<16x1xf32>
    %188 = arith.cmpf ole, %184, %187 : vector<16x1xf32>
    %189 = arith.andi %186, %188 : vector<16x1xi1>
    %cst_80 = arith.constant 5.000000e-01 : f32
    %cst_81 = arith.constant 0.000000e+00 : f32
    %190 = vector.broadcast %cst_80 : f32 to vector<16x1xf32>
    %191 = vector.broadcast %cst_81 : f32 to vector<16x1xf32>
    %192 = arith.select %189, %190, %191 : vector<16x1xi1>, vector<16x1xf32>
    %cst_82 = arith.constant 0.000000e+00 : f32
    %cst_83 = arith.constant 1.500000e+01 : f32
    %193 = vector.broadcast %cst_82 : f32 to vector<16x1xf32>
    %194 = arith.maximumf %193, %184 : vector<16x1xf32>
    %195 = vector.broadcast %cst_83 : f32 to vector<16x1xf32>
    %196 = arith.minimumf %195, %194 : vector<16x1xf32>
    %197 = vector.broadcast %196 : vector<16x1xf32> to vector<16x256xf32>
    %198 = vector.broadcast %2 : vector<1x256xf32> to vector<16x256xf32>
    %199 = arith.subf %197, %198 : vector<16x256xf32>
    %200 = math.absf %199 : vector<16x256xf32>
    %cst_84 = arith.constant 1.000000e+00 : f32
    %201 = vector.broadcast %cst_84 : f32 to vector<16x256xf32>
    %202 = arith.subf %201, %200 : vector<16x256xf32>
    %cst_85 = arith.constant 0.000000e+00 : f32
    %203 = vector.broadcast %cst_85 : f32 to vector<16x256xf32>
    %204 = arith.maximumf %203, %202 : vector<16x256xf32>
    %205 = vector.broadcast %192 : vector<16x1xf32> to vector<16x256xf32>
    %206 = arith.mulf %204, %205 : vector<16x256xf32>
    %207 = arith.addf %176, %206 : vector<16x256xf32>
    %208 = vector.broadcast %174 : f32 to vector<16x1xf32>
    %209 = arith.mulf %0, %208 : vector<16x1xf32>
    %210 = vector.broadcast %163 : f32 to vector<16x1xf32>
    %211 = arith.addf %210, %209 : vector<16x1xf32>
    %cst_86 = arith.constant 5.000000e-01 : f32
    %212 = arith.mulf %174, %cst_86 : f32
    %cst_87 = arith.constant 1.500000e+00 : f32
    %213 = arith.mulf %cst_87, %212 : f32
    %214 = vector.broadcast %213 : f32 to vector<16x1xf32>
    %215 = arith.addf %211, %214 : vector<16x1xf32>
    %cst_88 = arith.constant -1.000000e+00 : f32
    %216 = vector.broadcast %cst_88 : f32 to vector<16x1xf32>
    %217 = arith.cmpf oge, %215, %216 : vector<16x1xf32>
    %cst_89 = arith.constant 1.600000e+01 : f32
    %218 = vector.broadcast %cst_89 : f32 to vector<16x1xf32>
    %219 = arith.cmpf ole, %215, %218 : vector<16x1xf32>
    %220 = arith.andi %217, %219 : vector<16x1xi1>
    %cst_90 = arith.constant 5.000000e-01 : f32
    %cst_91 = arith.constant 0.000000e+00 : f32
    %221 = vector.broadcast %cst_90 : f32 to vector<16x1xf32>
    %222 = vector.broadcast %cst_91 : f32 to vector<16x1xf32>
    %223 = arith.select %220, %221, %222 : vector<16x1xi1>, vector<16x1xf32>
    %cst_92 = arith.constant 0.000000e+00 : f32
    %cst_93 = arith.constant 1.500000e+01 : f32
    %224 = vector.broadcast %cst_92 : f32 to vector<16x1xf32>
    %225 = arith.maximumf %224, %215 : vector<16x1xf32>
    %226 = vector.broadcast %cst_93 : f32 to vector<16x1xf32>
    %227 = arith.minimumf %226, %225 : vector<16x1xf32>
    %228 = vector.broadcast %227 : vector<16x1xf32> to vector<16x256xf32>
    %229 = vector.broadcast %2 : vector<1x256xf32> to vector<16x256xf32>
    %230 = arith.subf %228, %229 : vector<16x256xf32>
    %231 = math.absf %230 : vector<16x256xf32>
    %cst_94 = arith.constant 1.000000e+00 : f32
    %232 = vector.broadcast %cst_94 : f32 to vector<16x256xf32>
    %233 = arith.subf %232, %231 : vector<16x256xf32>
    %cst_95 = arith.constant 0.000000e+00 : f32
    %234 = vector.broadcast %cst_95 : f32 to vector<16x256xf32>
    %235 = arith.maximumf %234, %233 : vector<16x256xf32>
    %236 = vector.broadcast %223 : vector<16x1xf32> to vector<16x256xf32>
    %237 = arith.mulf %235, %236 : vector<16x256xf32>
    %238 = arith.addf %207, %237 : vector<16x256xf32>
    %cst_96 = arith.constant 0.000000e+00 : f32
    %239 = vector.broadcast %cst_96 : f32 to vector<16x256xf32>
    %240 = vector.broadcast %175 : f32 to vector<16x1xf32>
    %241 = arith.mulf %1, %240 : vector<16x1xf32>
    %242 = vector.broadcast %159 : f32 to vector<16x1xf32>
    %243 = arith.addf %242, %241 : vector<16x1xf32>
    %cst_97 = arith.constant 5.000000e-01 : f32
    %244 = arith.mulf %175, %cst_97 : f32
    %cst_98 = arith.constant 5.000000e-01 : f32
    %245 = arith.mulf %cst_98, %244 : f32
    %246 = vector.broadcast %245 : f32 to vector<16x1xf32>
    %247 = arith.addf %243, %246 : vector<16x1xf32>
    %cst_99 = arith.constant -1.000000e+00 : f32
    %248 = vector.broadcast %cst_99 : f32 to vector<16x1xf32>
    %249 = arith.cmpf oge, %247, %248 : vector<16x1xf32>
    %cst_100 = arith.constant 1.600000e+01 : f32
    %250 = vector.broadcast %cst_100 : f32 to vector<16x1xf32>
    %251 = arith.cmpf ole, %247, %250 : vector<16x1xf32>
    %252 = arith.andi %249, %251 : vector<16x1xi1>
    %cst_101 = arith.constant 5.000000e-01 : f32
    %cst_102 = arith.constant 0.000000e+00 : f32
    %253 = vector.broadcast %cst_101 : f32 to vector<16x1xf32>
    %254 = vector.broadcast %cst_102 : f32 to vector<16x1xf32>
    %255 = arith.select %252, %253, %254 : vector<16x1xi1>, vector<16x1xf32>
    %cst_103 = arith.constant 0.000000e+00 : f32
    %cst_104 = arith.constant 1.500000e+01 : f32
    %256 = vector.broadcast %cst_103 : f32 to vector<16x1xf32>
    %257 = arith.maximumf %256, %247 : vector<16x1xf32>
    %258 = vector.broadcast %cst_104 : f32 to vector<16x1xf32>
    %259 = arith.minimumf %258, %257 : vector<16x1xf32>
    %260 = vector.broadcast %259 : vector<16x1xf32> to vector<16x256xf32>
    %261 = vector.broadcast %3 : vector<1x256xf32> to vector<16x256xf32>
    %262 = arith.subf %260, %261 : vector<16x256xf32>
    %263 = math.absf %262 : vector<16x256xf32>
    %cst_105 = arith.constant 1.000000e+00 : f32
    %264 = vector.broadcast %cst_105 : f32 to vector<16x256xf32>
    %265 = arith.subf %264, %263 : vector<16x256xf32>
    %cst_106 = arith.constant 0.000000e+00 : f32
    %266 = vector.broadcast %cst_106 : f32 to vector<16x256xf32>
    %267 = arith.maximumf %266, %265 : vector<16x256xf32>
    %268 = vector.broadcast %255 : vector<16x1xf32> to vector<16x256xf32>
    %269 = arith.mulf %267, %268 : vector<16x256xf32>
    %270 = arith.addf %239, %269 : vector<16x256xf32>
    %271 = vector.broadcast %175 : f32 to vector<16x1xf32>
    %272 = arith.mulf %1, %271 : vector<16x1xf32>
    %273 = vector.broadcast %159 : f32 to vector<16x1xf32>
    %274 = arith.addf %273, %272 : vector<16x1xf32>
    %cst_107 = arith.constant 5.000000e-01 : f32
    %275 = arith.mulf %175, %cst_107 : f32
    %cst_108 = arith.constant 1.500000e+00 : f32
    %276 = arith.mulf %cst_108, %275 : f32
    %277 = vector.broadcast %276 : f32 to vector<16x1xf32>
    %278 = arith.addf %274, %277 : vector<16x1xf32>
    %cst_109 = arith.constant -1.000000e+00 : f32
    %279 = vector.broadcast %cst_109 : f32 to vector<16x1xf32>
    %280 = arith.cmpf oge, %278, %279 : vector<16x1xf32>
    %cst_110 = arith.constant 1.600000e+01 : f32
    %281 = vector.broadcast %cst_110 : f32 to vector<16x1xf32>
    %282 = arith.cmpf ole, %278, %281 : vector<16x1xf32>
    %283 = arith.andi %280, %282 : vector<16x1xi1>
    %cst_111 = arith.constant 5.000000e-01 : f32
    %cst_112 = arith.constant 0.000000e+00 : f32
    %284 = vector.broadcast %cst_111 : f32 to vector<16x1xf32>
    %285 = vector.broadcast %cst_112 : f32 to vector<16x1xf32>
    %286 = arith.select %283, %284, %285 : vector<16x1xi1>, vector<16x1xf32>
    %cst_113 = arith.constant 0.000000e+00 : f32
    %cst_114 = arith.constant 1.500000e+01 : f32
    %287 = vector.broadcast %cst_113 : f32 to vector<16x1xf32>
    %288 = arith.maximumf %287, %278 : vector<16x1xf32>
    %289 = vector.broadcast %cst_114 : f32 to vector<16x1xf32>
    %290 = arith.minimumf %289, %288 : vector<16x1xf32>
    %291 = vector.broadcast %290 : vector<16x1xf32> to vector<16x256xf32>
    %292 = vector.broadcast %3 : vector<1x256xf32> to vector<16x256xf32>
    %293 = arith.subf %291, %292 : vector<16x256xf32>
    %294 = math.absf %293 : vector<16x256xf32>
    %cst_115 = arith.constant 1.000000e+00 : f32
    %295 = vector.broadcast %cst_115 : f32 to vector<16x256xf32>
    %296 = arith.subf %295, %294 : vector<16x256xf32>
    %cst_116 = arith.constant 0.000000e+00 : f32
    %297 = vector.broadcast %cst_116 : f32 to vector<16x256xf32>
    %298 = arith.maximumf %297, %296 : vector<16x256xf32>
    %299 = vector.broadcast %286 : vector<16x1xf32> to vector<16x256xf32>
    %300 = arith.mulf %298, %299 : vector<16x256xf32>
    %301 = arith.addf %270, %300 : vector<16x256xf32>
    %302 = arith.mulf %238, %301 : vector<16x256xf32>
    %c16 = arith.constant 16 : index
    %c0_117 = arith.constant 0 : index
    %303 = vector.load %arg10[%c16, %c0_117] : memref<32x256xf32, #tpu.memory_space<vmem>>, vector<16x256xf32>
    tpu.vector_store %arg10[%c16, %c0_117], %302 {strides = array<i32>} : memref<32x256xf32, #tpu.memory_space<vmem>>, vector<16x256xf32>,
    %c0_118 = arith.constant 0 : index
    %c0_119 = arith.constant 0 : index
    %c0_120 = arith.constant 0 : index
    %304 = vector.load %arg8[%c0_118, %c0_119, %c0_120] : memref<1x256x128xf32, #tpu.memory_space<vmem>>, vector<1x256x128xf32>
    %305 = vector.shape_cast %304 : vector<1x256x128xf32> to vector<256x128xf32>
    %c0_121 = arith.constant 0 : index
    %c0_122 = arith.constant 0 : index
    %306 = vector.load %arg10[%c0_121, %c0_122] : memref<32x256xf32, #tpu.memory_space<vmem>>, vector<32x256xf32>
    %cst_123 = arith.constant dense<0.000000e+00> : vector<32x128xf32>
    %307 = tpu.matmul %306, %305, %cst_123 {dimension_numbers = #tpu.dot_dimension_numbers<[1], [0], [0], [1], [0, 0, 1, 1], [], []>} : vector<32x256xf32>, vector<256x128xf32>, vector<32x128xf32> -> vector<32x128xf32>
    %308 = vector.shape_cast %307 : vector<32x128xf32> to vector<2x16x128xf32>
    %c0_124 = arith.constant 0 : index
    %c0_125 = arith.constant 0 : index
    %c0_126 = arith.constant 0 : index
    %309 = vector.load %arg9[%c0_124, %c0_125, %c0_126] : memref<2x16x128xf32, #tpu.memory_space<vmem>>, vector<2x16x128xf32>
    tpu.vector_store %arg9[%c0_124, %c0_125, %c0_126], %308 {strides = array<i32>} : memref<2x16x128xf32, #tpu.memory_space<vmem>>, vector<2x16x128xf32>,
    return
  }
  func.func @transform_0(%arg0: i32, %arg1: i32, %arg2: memref<3xi32, #tpu.memory_space<smem>>) -> (i32, i32) {
    %c0_i32 = arith.constant 0 : i32
    %c0_i32_0 = arith.constant 0 : i32
    %c0_i32_1 = arith.constant 0 : i32
    return %c0_i32, %c0_i32_0 : i32, i32
  }
  func.func @transform_1(%arg0: i32, %arg1: i32, %arg2: memref<3xi32, #tpu.memory_space<smem>>) -> (i32, i32) {
    %c0_i32 = arith.constant 0 : i32
    %c0_i32_0 = arith.constant 0 : i32
    %c0_i32_1 = arith.constant 0 : i32
    return %c0_i32, %c0_i32_0 : i32, i32
  }
  func.func @transform_2(%arg0: i32, %arg1: i32, %arg2: memref<3xi32, #tpu.memory_space<smem>>) -> (i32, i32) {
    %c0_i32 = arith.constant 0 : i32
    %c0_i32_0 = arith.constant 0 : i32
    %c0_i32_1 = arith.constant 0 : i32
    return %c0_i32, %c0_i32_0 : i32, i32
  }
  func.func @transform_3(%arg0: i32, %arg1: i32, %arg2: memref<3xi32, #tpu.memory_space<smem>>) -> (i32, i32) {
    %c0_i32 = arith.constant 0 : i32
    %c0_i32_0 = arith.constant 0 : i32
    %c0_i32_1 = arith.constant 0 : i32
    return %c0_i32, %c0_i32_0 : i32, i32
  }
  func.func @transform_4(%arg0: i32, %arg1: i32, %arg2: memref<3xi32, #tpu.memory_space<smem>>) -> (i32, i32) {
    %c0_i32 = arith.constant 0 : i32
    %c0_i32_0 = arith.constant 0 : i32
    %c0_i32_1 = arith.constant 0 : i32
    return %c0_i32, %c0_i32_0 : i32, i32
  }
  func.func @transform_5(%arg0: i32, %arg1: i32, %arg2: memref<3xi32, #tpu.memory_space<smem>>) -> (i32, i32, i32) {
    %0 = arith.index_cast %arg1 : i32 to index
    %1 = memref.load %arg2[%0] : memref<3xi32, #tpu.memory_space<smem>>
    %c0_i32 = arith.constant 0 : i32
    %c0_i32_0 = arith.constant 0 : i32
    return %1, %c0_i32, %arg0 : i32, i32, i32
  }
  func.func @transform_6(%arg0: i32, %arg1: i32, %arg2: memref<3xi32, #tpu.memory_space<smem>>) -> (i32, i32, i32) {
    %c0_i32 = arith.constant 0 : i32
    %c0_i32_0 = arith.constant 0 : i32
    return %arg1, %c0_i32, %arg0 : i32, i32, i32
  }
}

</mosaic_0001>

<bundles_post_ra>
// kernel: tpu_custom_call.1
= control target key start
LH: loop header
LB: loop body
LE: loop exit
PB: predicated region body
PF: predicated region fallthrough
CT: control target
= control target key end

     0   :  { %s2397_s0 = inlined_call_operand.vmem [shape: s32[3], index: 0, kind: input, shape index: {}]   ;;  %s2398_s1 = inlined_call_operand.vmem [shape: f32[5,6], index: 1, kind: input, shape index: {}]   ;;  %s2399_s2 = inlined_call_operand.vmem [shape: f32[16,1], index: 2, kind: input, shape index: {}]   ;;  %s2400_s3 = inlined_call_operand.vmem [shape: f32[16,1], index: 3, kind: input, shape index: {}]   ;;  %s2401_s4 = inlined_call_operand.vmem [shape: f32[1,256], index: 4, kind: input, shape index: {}]   ;;  %s2402_s5 = inlined_call_operand.vmem [shape: f32[1,256], index: 5, kind: input, shape index: {}]   ;;  %s2403_s6 = inlined_call_operand.hbm [shape: f32[2,256,128], index: 6, kind: input, shape index: {}]   ;;  %s2404_s7 = inlined_call_operand.hbm [shape: f32[6,16,128], index: 7, kind: output, shape index: {}]  }
   0x1   :  { %2423 = sst [smem:[#allocation28_spill]] %s2398_s1  ;;  %s12_s26 = sshll.u32 %s2397_s0, 4  ;;  %s13_s26 = int_to_ptr.vmem [resolvable:$true] %s12_s26 }
   0x2   :  { %2424 = sst [smem:[#allocation29_spill]] %s2403_s6  ;;  %s1461_s27 = scalar_lea.vmem %s13_s26, 16 }
   0x3   :  { %2425 = sst [smem:[#allocation30_spill]] %s2404_s7  ;;  %p1462_p0 = scmp.ne.s32.totalorder %s13_s26, %s1461_s27 }
   0x4   :  { %p1466_p1 = scmp.lt.s32.totalorder %s13_s26, %s13_s26  ;;  %p1467_p2 = scmp.lt.s32.totalorder %s1461_s27, %s1461_s27 }
   0x6   :  { %p1468_p3 = por %p1467_p2, %p1466_p1 }
   0x8   :  { %p1469_p4 = pnand %p1468_p3, %p1462_p0 }
   0xa   :  { %1472 = shalt.err (!%p1469_p4)  }
   0xb   :  { %s1628_s28 = smov [#allocation4]  }
   0xc   :  { %15 = dma.vmem_to_smem %s13_s26, 16, %s1628_s28, [#allocation3] }
   0xd   :  { %1578 = dma.done.wait [#allocation3], 16 }
   0xe   :  { %1579 = vsyncadd [#allocation3], 4294967280 }
   0xf   :  { %17 = sfence }
  0x10   :  { %18 = vsyncpa [#allocation8], 0 }
  0x11   :  { %19 = vsyncpa [#allocation6], 0 }
  0x12   :  { %21 = vsyncpa [#allocation6 + $0x1], 0 }
  0x13   :  { %22 = vsyncpa [#allocation7], 0 }
  0x14   :  { %24 = vsyncpa [#allocation7 + $0x1], 0  ;;  %s1681_s29 = smov 0   ;;  %s1683_s0 = smov 0  }
  0x15   :  { %s1685_s30 = smov 0   ;;  %s1687_s8 = smov 0  }
  0x16   :  { %s1689_s9 = smov 0   ;;  %s1691_s10 = smov 0  }
  0x17   :  { %s1693_s11 = smov 0   ;;  %s1695_s12 = smov 0  }
  0x18   :  { %s1697_s13 = smov 0  }
  0x19 LB: > { %2426 = sst [smem:[#allocation17_spill]] %s1594_s29  ;;  %s1181_s14 = sadd.s32 4294967295, %s1626_s13   ;;  %s1626_s13 = sphi %s1697_s13, %s30_s13   ;;  %s1622_s12 = sphi %s1695_s12, %s2493_s12   ;;  %s1618_s11 = sphi %s1693_s11, %s2492_s11   ;;  %s1614_s10 = sphi %s1691_s10, %s2491_s10   ;;  %s1610_s9 = sphi %s1689_s9, %s2490_s9   ;;  %s1606_s8 = sphi %s1687_s8, %s2489_s8   ;;  %s1602_s30 = sphi %s1685_s30, %s2488_s30   ;;  %s1598_s0 = sphi %s1683_s0, %s2495_s0   ;;  %s1594_s29 = sphi %s1681_s29, %s2494_s29  }
  0x1a   : > { %2427 = sst [smem:[#allocation18_spill]] %s1602_s30  ;;  %s1182_s15 = sadd.s32 4294967294, %s1626_s13  }
  0x1b   : > { %2428 = sst [smem:[#allocation19_spill]] %s1610_s9  ;;  %p171_p5 = scmp.ne.s32.totalorder %s1610_s9, %s1606_s8 }
  0x1c   : > { %2429 = sst [smem:[#allocation20_spill]] %s1614_s10  ;;  %p165_p6 = scmp.ne.s32.totalorder %s1614_s10, %s1610_s9 }
  0x1d   : > { %2430 = sst [smem:[#allocation21_spill]] %s1622_s12  ;;  %p1729_p7 = scmp.eq.s32.totalorder %s1181_s14, 0 }
  0x1e   : > { %2431 = sst [smem:[#allocation22_spill]] %s1626_s13  ;;  %p166_p8 = scmp.eq.s32.totalorder %s1626_s13, 0 }
  0x1f   : > { %s2432_s16 = scalar_select %p1729_p7, 1, 0 }
  0x20   : > { %p196_p9 = scmp.ne.s32.totalorder %s1602_s30, %s1598_s0  ;;  %p1738_p10 = por %p1729_p7, %p171_p5 }
  0x21   : > { %p197_p11 = scmp.eq.s32.totalorder %s1181_s14, 2  ;;  %p202_p12 = scmp.ne.s32.totalorder %s1598_s0, %s1594_s29 }
  0x22   : > { %s2433_s17 = scalar_select %p1738_p10, 1, 0 }
  0x23   : > { %p203_p13 = scmp.eq.s32.totalorder %s1182_s15, 2  ;;  %p1744_p0 = por %p197_p11, %p196_p9 }
  0x24   : > { %p1183_p1 = scmp.ge.s32.totalorder %s1626_s13, 1  ;;  %p210_p3 = scmp.lt.s32.totalorder %s1626_s13, 4 }
  0x25   : > { %s2434_s18 = scalar_select %p1744_p0, 1, 0 }
  0x26   : > { %p1749_p2 = por %p203_p13, %p202_p12  ;;  %s2438_s1 = sld [smem:[#allocation28_spill]] }
  0x27   : > { %2435 = sst [smem:[#allocation23_spill]] %s2434_s18  ;;  %p1760_p4 = por %p166_p8, %p165_p6 }
  0x28   : > { %s2436_s19 = scalar_select %p1749_p2, 1, 0 }
  0x29   : > { %p1764_p5 = pnand %p1183_p1, %p210_p3  ;;  %s39_s26 = sadd.s32 1, %s1622_s12 }
  0x2a   : > { %2437 = sst [smem:[#allocation24_spill]] %s2436_s19  ;;  %p1777_p12 = scmp.ge.s32.totalorder %s39_s26, 3 }
  0x2b   : > { %s2440_s24 = scalar_select %p1764_p5, 1, 0 }
  0x2c   : > { %s223_s22 = sshll.u32 %s2438_s1, 4  ;;  %p1321_p9 = pneg %p1764_p5  ;;  %s224_s22 = int_to_ptr.vmem [resolvable:$true] %s223_s22 }
  0x2d   : > { %s151_s28 = sld [smem:[#allocation4 + %s1622_s12]]  ;;  %s2409_s8 = sand.u32 1, %s1614_s10  }
  0x2e   : > { %p1772_p11 = pnand %p1321_p9, %p1729_p7  ;;  %s1473_s14 = scalar_lea.vmem %s224_s22, 128 }
  0x2f   : > { %p1474_p6 = scmp.ne.s32.totalorder %s224_s22, %s1473_s14  ;;  %p1481_p3 = scmp.lt.s32.totalorder %s224_s22, %s224_s22 }
  0x30   : > { %p1475_p8 = pneg %p1772_p11  ;;  %p1482_p2 = scmp.lt.s32.totalorder %s1473_s14, %s1473_s14 }
  0x32   : > { %p1476_p13 = pnand %p1475_p8, %p1474_p6  ;;  %p1483_p9 = por %p1482_p2, %p1481_p3 }
  0x34   : > { %p1477_p1 = pneg %p1476_p13 }
  0x36   : > { %p1484_p0 = pnand %p1483_p9, %p1477_p1 }
  0x38   : > { %1487 = shalt.err (!%p1484_p0)
}
  0x39   : > { %s1629_s15 = smov [#allocation5]   ;;  %s2497_s26 = smov (%p1777_p12, %s39_s26), 0 }
  0x3a   : > { %1324 = dma.vmem_to_smem (!%p1772_p11), %s224_s22, 128, %s1629_s15, [#allocation8]  }
  0x3b   : > { %2443 = sst [smem:[#allocation25_spill]] %s2497_s26  ;;  %s186_s20 = sadd.s32 1, %s1602_s30 }
  0x3c   : > { %p1336_p0 = scmp.lt.s32.totalorder %s1626_s13, 3  ;;  %s152_s21 = sld [smem:[#allocation4 + %s2497_s26]] }
  0x3d   : > { %s181_s25 = ssub.s32 %s1622_s12, %s2497_s26  ;;  %s1186_s14 = sshll.u32 %s2409_s8, 8 }
  0x3e   : > { %p184_p2 = scmp.eq.s32.totalorder %s181_s25, 0  ;;  %s158_s27 = sadd.s32 1, %s1614_s10 }
  0x3f   : > { %s1313_s1 = scalar_select %p1760_p4, [#allocation4], [#allocation11] }
  0x40   : > { %s1801_s19 = scalar_select %p184_p2, %s1602_s30, %s186_s20  }
  0x41   : > { %s1314_s22 = scalar_select %p1760_p4, %s1622_s12, 0 }
  0x42   : > { %2444 = sst [smem:[#allocation26_spill]] %s1801_s19  ;;  %s2499_s1 = smov (!%p1336_p0, %s1313_s1), [#allocation12] }
  0x43   : > { %s153_s15 = ssub.s32 %s151_s28, %s152_s21  ;;  %s2501_s22 = smov (!%p1336_p0, %s1314_s22), 0 }
  0x44   : > { %p156_p11 = scmp.eq.s32.totalorder %s153_s15, 0  ;;  %s251_s26 = sld [smem:[%s2499_s1 + %s2501_s22]] }
  0x45   : > { %p1818_p12 = pnand %p1336_p0, %p1760_p4  ;;  %s250_s20 = scalar_lea.vmem [#allocation9], %s1186_s14 }
  0x46   : > { %s1812_s29 = scalar_select %p156_p11, %s1614_s10, %s158_s27  }
  0x47   : > { %s259_s8 = sshll.u32 %s250_s20, 4  ;;  %s2447_s6 = sld [smem:[#allocation29_spill]]  ;;  %s1822_s8 = int_to_ptr.vmem [resolvable:$true] %s259_s8 }
  0x48   : > { %2445 = sst [smem:[#allocation27_spill]] %s1812_s29  ;;  %s2448_s27 = sand.u32 1, %s1614_s10  }
  0x49   : > { %s1831_s1 = scalar_lea.sflag [#allocation6], %s2448_s27  ;;  %p1490_p6 = pneg %p1818_p12 }
  0x4a   : > { %s1216_s12 = sshll.u32 %s251_s26, 12 }
  0x4d   : > { %s1827_s21 = scalar_lea.hbm %s2447_s6, %s1216_s12  ;;  %s1493_s26 = scalar_lea.hbm %s2447_s6, 8192 }
  0x4e   : > { %s1488_s23 = scalar_lea.hbm %s1827_s21, 4096  ;;  %p1494_p1 = scmp.lt.s32.totalorder %s1827_s21, %s2447_s6 }
  0x4f   : > { %p1489_p4 = scmp.ne.s32.totalorder %s1827_s21, %s1488_s23  ;;  %p1495_p3 = scmp.lt.s32.totalorder %s1493_s26, %s1488_s23 }
  0x51   : > { %p1491_p8 = pnand %p1490_p6, %p1489_p4  ;;  %p1496_p9 = por %p1495_p3, %p1494_p1 }
  0x53   : > { %p1492_p13 = pneg %p1491_p8 }
  0x55   : > { %p1497_p0 = pnand %p1496_p9, %p1492_p13 }
  0x57   : > { %1500 = shalt.err (!%p1497_p0)
}
  0x58   : > { %s1501_s12 = scalar_lea.vmem %s1822_s8, 4096  ;;  %s1630_s20 = smov [#allocation9]  }
  0x59   : > { %p1502_p2 = scmp.ne.s32.totalorder %s1822_s8, %s1501_s12  ;;  %s1506_s28 = sshll.u32 %s1630_s20, 4  ;;  %s1507_s28 = int_to_ptr.vmem [resolvable:$false] %s1506_s28 }
  0x5a   : > { %s1508_s27 = scalar_lea.vmem %s1507_s28, 8192  ;;  %p1509_p8 = scmp.lt.s32.totalorder %s1822_s8, %s1507_s28 }
  0x5b   : > { %p1504_p11 = pnand %p1502_p2, %p1490_p6  ;;  %p1510_p10 = scmp.lt.s32.totalorder %s1508_s27, %s1501_s12 }
  0x5d   : > { %p1505_p4 = pneg %p1504_p11  ;;  %p1511_p7 = por %p1510_p10, %p1509_p8 }
  0x5f   : > { %p1512_p5 = pnand %p1511_p7, %p1505_p4 }
  0x61   : > { %1515 = shalt.err (!%p1512_p5)
}
  0x62   : > { %s1631_s23 = smov 128   ;;  %s1632_s14 = smov 8  }
  0x63   : > { %1330 = dma.hbm_to_vmem [thread:$0]  (!%p1818_p12), %s1827_s21, 4096, %s1822_s8, %s1831_s1, %s1631_s23, %s1631_s23, %s1632_s14  }
  0x64   : > { %p2449_p6 = scmp.ne.s32.totalorder %s2440_s24, 0 }
  0x65   : > { %p2450_p13 = scmp.ne.s32.totalorder (!%p2449_p6), %s2432_s16, 0 }
  0x66   : > { %271 = sbr.rel (%p2449_p6) target bundleno = 542 (0x21e), region = 44 }
  0x6b   : > { %1581 = dma.done.wait (%p2450_p13), [#allocation8], 128  }
  0x6c   : > { %1583 = vsyncadd (%p2450_p13), [#allocation8], 4294967168  ;;  %s277_s22 = sand.u32 1, %s1610_s9   ;;  %p2451_p7 = scmp.ne.s32.totalorder %s2433_s17, 0 }
  0x6d   : > { %s1191_s26 = sshll.u32 %s277_s22, 8  ;;  %s278_s15 = scalar_lea.sflag [#allocation6], %s277_s22 }
  0x6e   : > { %s1859_s19 = scalar_lea.vmem [#allocation9], %s1191_s26 }
  0x6f   : > { %1585 = dma.done.wait (%p2451_p7), %s278_s15, 4096  }
  0x70   : > { %1587 = vsyncadd (%p2451_p7), %s278_s15, 4294963200 }
  0x71   : > { %286 = sfence }
  0x72   : > { %s1193_s24 = sshll.u32 %s1618_s11, 1  ;;  %v1633_v0 = vmov 0   ;;  %v315_v1 = vld [vmem:[%s2400_s3] sm:$0xff]  ;;  %v1895_v5 = vld [vmem:[%s2400_s3 + $0x8] sm:$0xff]  ;;  %v970_v58 = vld [vmem:[%s1859_s19 + $0xf8] sm:$0xff] }
  0x73   : > { %1420 = vset.pattern.permute.xlu1 %v1633_v0  ;;  %1419 = vset.pattern.permute.xlu0 %v1633_v0  ;;  %s320_s16 = sshra.s32 %s1193_s24, 7  ;;  %s325_s8 = sand.u32 127, %s1193_s24  ;;  %v313_v12 = vld [vmem:[%s2399_s2] sm:$0xff]  ;;  %v314_v13 = vld [vmem:[%s2399_s2 + $0x8] sm:$0xff]  ;;  %v954_v62 = vld [vmem:[%s1859_s19 + $0x78] sm:$0xff] }
  0x74   : > { %s1217_s25 = sshll.u32 %s320_s16, 7  ;;  %s640_s21 = sadd.s32 1, %s1193_s24  ;;  %1235 = vmatprep.subr.mxu0 %v970_v58  ;;  %1279 = vmatprep.subr.mxu1 %v970_v58  ;;  %v969_v0 = vld [vmem:[%s1859_s19 + $0xf0] sm:$0xff] }
  0x75   : > { %s1218_s1 = sadd.s32 128, %s1217_s25  ;;  %s1222_s12 = sadd.s32 384, %s1217_s25  ;;  %1236 = vmatpush3.msra.mxu0 %v954_v62  ;;  %1295 = vmatpush3.msra.mxu1 %v954_v62 }
  0x76   : > { %s326_s20 = sadd.s32 %s1218_s1, %s325_s8  ;;  %s338_s28 = sadd.s32 %s1222_s12, %s325_s8  ;;  %1237 = vmatprep.subr.mxu0 %v969_v0  ;;  %1280 = vmatprep.subr.mxu1 %v969_v0 }
  0x77   : > { %s327_s27 = sld [smem:[#allocation5 + %s326_s20]]  ;;  %s641_s23 = sshra.s32 %s640_s21, 7 }
  0x78   : > { %s339_s14 = sld [smem:[#allocation5 + %s338_s28]]  ;;  %s1866_s22 = sshll.u32 %s641_s23, 7 }
  0x79   : > { %s1226_s17 = sadd.s32 128, %s1866_s22  ;;  %s1869_s26 = sand.u32 127, %s640_s21 }
  0x7a   : > { %s647_s15 = sadd.s32 %s1226_s17, %s1869_s26  ;;  %s1230_s6 = sadd.s32 384, %s1866_s22 }
  0x7b   : > { %s648_s16 = sld [smem:[#allocation5 + %s647_s15]]  ;;  %s659_s24 = sadd.s32 %s1230_s6, %s1869_s26 }
  0x7c   : > { %s660_s29 = sld [smem:[#allocation5 + %s659_s24]]  ;;  %s1220_s1 = sadd.s32 256, %s1217_s25 }
  0x7d   : > { %s328_s12 = smul.f32 0.5, %s327_s27  ;;  %s332_s20 = sadd.s32 %s1220_s1, %s325_s8 }
  0x7e   : > { %s340_s10 = smul.f32 0.5, %s339_s14  ;;  %s333_s28 = sld [smem:[#allocation5 + %s332_s20]] }
  0x7f   : > { %s1874_s23 = sadd.f32 -0.5, %s328_s12  ;;  %s1224_s21 = sadd.s32 512, %s1217_s25 }
  0x80   : > { %s1199_s9 = sadd.f32 -0.5, %s340_s10  ;;  %s344_s30 = sadd.s32 %s1224_s21, %s325_s8 }
  0x81   : > { %s649_s13 = smul.f32 0.5, %s648_s16  ;;  %s345_s17 = sld [smem:[#allocation5 + %s344_s30]]  ;;  %v497_v3 = vstv %s1874_s23 }
  0x82   : > { %s348_s7 = ssub.f32 %s1199_s9, %s1874_s23  ;;  %s661_s15 = smul.f32 0.5, %s660_s29 }
  0x83   : > { %s1877_s6 = sadd.f32 -0.5, %s649_s13  ;;  %s1228_s24 = sadd.s32 256, %s1866_s22 }
  0x84   : > { %s355_s14 = smul.f32 0.25, %s348_s7  ;;  %s1207_s12 = sadd.f32 -0.5, %s661_s15 }
  0x85   : > { %s334_s20 = smul.f32 0.5, %s333_s28  ;;  %s653_s18 = sadd.s32 %s1228_s24, %s1869_s26  ;;  %v807_v31 = vstv %s1877_s6 }
  0x86   : > { %v494_v2 = vstv %s355_s14  ;;  %s500_s10 = smul.f32 0.5, %s355_s14  ;;  %s669_s30 = ssub.f32 %s1207_s12, %s1877_s6 }
  0x87   : > { %v495_v4 = vmul.f32 %v494_v2, %v315_v1  ;;  %s1886_s29 = sadd.f32 -0.5, %s334_s20  ;;  %s346_s9 = smul.f32 0.5, %s345_s17  ;;  %v496_v9 = vmul.f32 %v494_v2, %v1895_v5 }
  0x88   : > { %s1888_s13 = smul.f32 0.5, %s500_s10  ;;  %s1890_s8 = sld [smem:[#allocation5 + %s653_s18]] }
  0x89   : > { %v498_v6 = vadd.f32 %v497_v3, %v495_v4  ;;  %s1201_s16 = sadd.f32 -0.5, %s346_s9  ;;  %s1232_s28 = sadd.s32 512, %s1866_s22  ;;  %v359_v17 = vstv %s1886_s29  ;;  %v499_v19 = vadd.f32 %v497_v3, %v496_v9 }
  0x8a   : > { %v502_v7 = vstv %s1888_s13  ;;  %s1899_s23 = smul.f32 1.5, %s500_s10  ;;  %s665_s17 = sadd.s32 %s1232_s28, %s1869_s26 }
  0x8b   : > { %v1901_v8 = vadd.f32 %v502_v7, %v498_v6  ;;  %s349_s21 = ssub.f32 %s1201_s16, %s1886_s29  ;;  %s1906_s18 = smul.f32 0.25, %s669_s30  ;;  %v1945_v40 = vadd.f32 %v502_v7, %v499_v19 }
  0x8c   : > { %s666_s15 = sld [smem:[#allocation5 + %s665_s17]]  ;;  %v573_v10 = vstv %s1899_s23 }
  0x8d   : > { %v513_v11 = vmax.f32 %v1901_v8, 0.0  ;;  %s352_s14 = smul.f32 0.25, %s349_s21  ;;  %v1916_v14 = vadd.f32 %v573_v10, %v498_v6  ;;  %v804_v23 = vstv %s1906_s18  ;;  %v1927_v28 = vadd.f32 %v573_v10, %v499_v19  ;;  %v968_v10 = vld [vmem:[%s1859_s19 + $0xe8] sm:$0xff]  ;;  %s2480_s22 = sld [smem:[#allocation23_spill]] }
  0x8e   : > { %s655_s26 = smul.f32 0.5, %s1890_s8  ;;  %v805_v29 = vmul.f32 %v804_v23, %v315_v1  ;;  %v806_v54 = vmul.f32 %v804_v23, %v1895_v5  ;;  %v514_v56 = vmax.f32 %v1945_v40, 0.0  ;;  %v953_v5 = vld [vmem:[%s1859_s19 + $0x70] sm:$0xff]  ;;  %vm505_vm0 = vcmp.ge.f32.partialorder %v1901_v8, -1.0  ;;  %v950_v23 = vld [vmem:[%s1859_s19 + $0x58] sm:$0xff] }
  0x8f   : > { %v515_v15 = vmin.f32 %v513_v11, 15.0  ;;  %v356_v16 = vstv %s352_s14  ;;  %s362_s12 = smul.f32 0.5, %s352_s14  ;;  %v584_v18 = vmax.f32 %v1916_v14, 0.0  ;;  %v585_v39 = vmax.f32 %v1927_v28, 0.0  ;;  %1238 = vmatpush3.msra.mxu0 %v953_v5  ;;  %1296 = vmatpush3.msra.mxu1 %v953_v5  ;;  %s1234_s14 = sshll.u32 %s1618_s11, 9 }
  0x90   : > { %v357_v20 = vmul.f32 %v356_v16, %v313_v12  ;;  %v358_v21 = vmul.f32 %v356_v16, %v314_v13  ;;  %s810_s20 = smul.f32 0.5, %s1906_s18  ;;  %s1923_s30 = sadd.f32 -0.5, %s655_s26  ;;  %v808_v42 = vadd.f32 %v807_v31, %v805_v29  ;;  %v809_v4 = vadd.f32 %v807_v31, %v806_v54  ;;  %1239 = vmatprep.subr.mxu0 %v968_v10  ;;  %v949_v31 = vld [vmem:[%s1859_s19 + $0x50] sm:$0xff] }
  0x91   : > { %519 = vperm.xlu1 %1420, %v515_v15   ;;  %s363_s10 = smul.f32 0.5, %s362_s12  ;;  %v586_v22 = vmin.f32 %v584_v18, 15.0  ;;  %v587_v50 = vmin.f32 %v585_v39, 15.0  ;;  %v516_v6 = vmin.f32 %v514_v56, 15.0  ;;  %v951_v18 = vld [vmem:[%s1859_s19 + $0x60] sm:$0xff]  ;;  %vm507_vm1 = vcmp.le.f32.partialorder %v1901_v8, 16.0  ;;  %1281 = vmatprep.subr.mxu1 %v968_v10 }
  0x92   : > { %v360_v24 = vadd.f32 %v359_v17, %v357_v20  ;;  %v361_v25 = vadd.f32 %v359_v17, %v358_v21  ;;  %s667_s9 = smul.f32 0.5, %s666_s15  ;;  %v680_v41 = vstv %s1923_s30  ;;  %vm576_vm2 = vcmp.ge.f32.partialorder %v1916_v14, -1.0  ;;  %vm2001_vm4 = vmand %vm505_vm0, %vm507_vm1  ;;  %v961_v54 = vld [vmem:[%s1859_s19 + $0xb0] sm:$0xff]  ;;  %s308_s15 = sand.u32 1, %s1598_s0  }
  0x93   : > { %v364_v26 = vstv %s363_s10  ;;  %s434_s29 = smul.f32 1.5, %s362_s12  ;;  %vm578_vm3 = vcmp.le.f32.partialorder %v1916_v14, 16.0  ;;  %v1634_v39 = vmov 0.0   ;;  %v963_v14 = vld [vmem:[%s1859_s19 + $0xc0] sm:$0xff]  ;;  %vm506_vm0 = vcmp.ge.f32.partialorder %v1945_v40, -1.0  ;;  %s1192_s24 = sshll.u32 %s308_s15, 5 }
  0x94   : > { %v1925_v27 = vadd.f32 %v364_v26, %v360_v24  ;;  %s1209_s13 = sadd.f32 -0.5, %s667_s9  ;;  %s1932_s8 = smul.f32 1.5, %s810_s20  ;;  %v1934_v32 = vadd.f32 %v364_v26, %v361_v25  ;;  %vm2014_vm7 = vmand %vm576_vm2, %vm578_vm3  ;;  %vm508_vm1 = vcmp.le.f32.partialorder %v1945_v40, 16.0 }
  0x95   : > { %590 = vperm.xlu1 %1420, %v586_v22   ;;  %v435_v30 = vstv %s434_s29  ;;  %s1952_s16 = smul.f32 0.5, %s810_s20  ;;  %v966_v22 = vld [vmem:[%s1859_s19 + $0xd8] sm:$0xff]  ;;  %s310_s27 = scalar_lea.vmem [#allocation10], %s1192_s24 }
  0x96   : > { %v375_v33 = vmax.f32 %v1925_v27, 0.0  ;;  %s670_s7 = ssub.f32 %s1209_s13, %s1923_s30  ;;  %v1938_v34 = vadd.f32 %v435_v30, %v360_v24  ;;  %v1940_v35 = vadd.f32 %v435_v30, %v361_v25  ;;  %v872_v43 = vstv %s1932_s8  ;;  %v965_v24 = vld [vmem:[%s1859_s19 + $0xd0] sm:$0xff]  ;;  %s1084_s1 = sshll.u32 %s310_s27, 4  ;;  %s2336_s1 = int_to_ptr.vmem [resolvable:$true] %s1084_s1 }
  0x97   : > { %v376_v47 = vmax.f32 %v1934_v32, 0.0  ;;  %v1956_v52 = vadd.f32 %v872_v43, %v808_v42  ;;  %v812_v61 = vstv %s1952_s16  ;;  %v1981_v17 = vadd.f32 %v872_v43, %v809_v4  ;;  %s2481_s20 = sld [smem:[#allocation30_spill]]  ;;  %s2343_s30 = scalar_lea.sflag [#allocation7], %s308_s15 }
  0x98   : > { %v377_v36 = vmin.f32 %v375_v33, 15.0  ;;  %s673_s25 = smul.f32 0.25, %s670_s7  ;;  %v446_v37 = vmax.f32 %v1938_v34, 0.0  ;;  %v447_v38 = vmax.f32 %v1940_v35, 0.0  ;;  %v1975_v9 = vadd.f32 %v812_v61, %v808_v42  ;;  %s1516_s9 = scalar_lea.vmem %s2336_s1, 512 }
  0x99   : > { %v378_v55 = vmin.f32 %v376_v47, 15.0  ;;  %v883_v2 = vmax.f32 %v1956_v52, 0.0  ;;  %v884_v26 = vmax.f32 %v1981_v17, 0.0  ;;  %v1995_v29 = vadd.f32 %v812_v61, %v809_v4  ;;  %v945_v61 = vld [vmem:[%s1859_s19 + $0x30] sm:$0xff]  ;;  %p1517_p10 = scmp.ne.s32.totalorder %s2336_s1, %s1516_s9  ;;  %p2482_p5 = scmp.ne.s32.totalorder %s2480_s22, 0 }
  0x9a   : > { %v677_v44 = vstv %s673_s25  ;;  %381 = vperm.xlu0 %1419, %v377_v36   ;;  %v448_v45 = vmin.f32 %v446_v37, 15.0  ;;  %v449_v46 = vmin.f32 %v447_v38, 15.0  ;;  %s683_s6 = smul.f32 0.5, %s673_s25  ;;  %v823_v20 = vmax.f32 %v1975_v9, 0.0  ;;  %v964_v37 = vld [vmem:[%s1859_s19 + $0xc8] sm:$0xff]  ;;  %s1635_s11 = smov [#allocation10]  }
  0x9b   : > { %v678_v48 = vmul.f32 %v677_v44, %v313_v12  ;;  %v679_v49 = vmul.f32 %v677_v44, %v314_v13  ;;  %v952_v12 = vld [vmem:[%s1859_s19 + $0x68] sm:$0xff]  ;;  %v967_v13 = vld [vmem:[%s1859_s19 + $0xe0] sm:$0xff]  ;;  %v885_v15 = vmin.f32 %v883_v2, 15.0  ;;  %vm367_vm5 = vcmp.ge.f32.partialorder %v1925_v27, -1.0  ;;  %p1518_p12 = pnand %p1517_p10, %p2482_p5  ;;  %s1520_s29 = sshll.u32 %s1635_s11, 4  ;;  %s1521_s29 = int_to_ptr.vmem [resolvable:$false] %s1520_s29 }
  0x9c   : > { %457 = vperm.xlu1 %1420, %v449_v46   ;;  %s744_s28 = smul.f32 1.5, %s683_s6  ;;  %1240 = vmatpush3.msra.mxu0 %v952_v12  ;;  %v825_v33 = vmin.f32 %v823_v20, 15.0  ;;  %vm369_vm6 = vcmp.le.f32.partialorder %v1925_v27, 16.0  ;;  %vm815_vm8 = vcmp.ge.f32.partialorder %v1975_v9, -1.0  ;;  %vm817_vm9 = vcmp.le.f32.partialorder %v1975_v9, 16.0  ;;  %v948_v38 = vld [vmem:[%s1859_s19 + $0x48] sm:$0xff]  ;;  %p1523_p3 = scmp.lt.s32.totalorder %s2336_s1, %s1521_s29 }
  0x9d   : > { %v681_v51 = vadd.f32 %v680_v41, %v678_v48  ;;  %s1954_s23 = smul.f32 0.5, %s683_s6  ;;  %v682_v53 = vadd.f32 %v680_v41, %v679_v49  ;;  %1241 = vmatprep.subr.mxu0 %v967_v13  ;;  %1297 = vmatpush3.msra.mxu1 %v952_v12  ;;  %v511_v41 = vsel %vm2001_vm4, 0.5, %v1634_v39  ;;  %vm875_vm10 = vcmp.ge.f32.partialorder %v1956_v52, -1.0  ;;  %vm2032_vm12 = vmand %vm367_vm5, %vm369_vm6  ;;  %v962_v49 = vld [vmem:[%s1859_s19 + $0xb8] sm:$0xff]  ;;  %v959_v9 = vld [vmem:[%s1859_s19 + $0xa0] sm:$0xff]  ;;  %s2341_s10 = scalar_lea.hbm %s2481_s20, %s1234_s14 }
  0x9e   : > { %452 = vperm.xlu0 %1419, %v448_v45   ;;  %v745_v57 = vstv %s744_s28  ;;  %1242 = vmatpush3.msra.mxu0 %v951_v18  ;;  %vm877_vm11 = vcmp.le.f32.partialorder %v1956_v52, 16.0  ;;  %v886_v42 = vmin.f32 %v884_v26, 15.0  ;;  %v824_v43 = vmax.f32 %v1995_v29, 0.0  ;;  %v947_v45 = vld [vmem:[%s1859_s19 + $0x40] sm:$0xff]  ;;  %vm2046_vm15 = vmand %vm815_vm8, %vm817_vm9  ;;  %v957_v20 = vld [vmem:[%s1859_s19 + $0x90] sm:$0xff]  ;;  %p1519_p1 = pneg %p1518_p12  ;;  %s1522_s13 = scalar_lea.vmem %s1521_s29, 1024 }
  0x9f   : > { %v1961_v59 = vadd.f32 %v745_v57, %v681_v51  ;;  %v685_v60 = vstv %s1954_s23  ;;  %v1971_v3 = vadd.f32 %v745_v57, %v682_v53  ;;  %1243 = vmatprep.subr.mxu0 %v966_v22  ;;  %1282 = vmatprep.subr.mxu1 %v967_v13  ;;  %vm438_vm13 = vcmp.ge.f32.partialorder %v1938_v34, -1.0  ;;  %vm2056_vm2 = vmand %vm875_vm10, %vm877_vm11  ;;  %v940_v26 = vld [vmem:[%s1859_s19 + $0x8] sm:$0xff]  ;;  %v317_v44 = vld [vmem:[%s2401_s4] sm:$0x3]  ;;  %p1524_p9 = scmp.lt.s32.totalorder %s1522_s13, %s1516_s9 }
  0xa0   : > { %595 = vperm.xlu1 %1420, %v587_v50   ;;  %v1966_v63 = vadd.f32 %v685_v60, %v681_v51  ;;  %v1986_v21 = vadd.f32 %v685_v60, %v682_v53  ;;  %1244 = vmatpush3.msra.mxu0 %v950_v23  ;;  %vm440_vm14 = vcmp.le.f32.partialorder %v1938_v34, 16.0  ;;  %v582_v47 = vsel %vm2014_vm7, 0.5, %v1634_v39  ;;  %v946_v51 = vld [vmem:[%s1859_s19 + $0x38] sm:$0xff]  ;;  %vm2080_vm10 = vmand %vm506_vm0, %vm508_vm1 }
  0xa1   : > { %v756_v1 = vmax.f32 %v1961_v59, 0.0  ;;  %v757_v16 = vmax.f32 %v1971_v3, 0.0  ;;  %1245 = vmatprep.subr.mxu0 %v965_v24  ;;  %1298 = vmatpush3.msra.mxu1 %v951_v18  ;;  %vm2067_vm5 = vmand %vm438_vm13, %vm440_vm14  ;;  %vm577_vm6 = vcmp.ge.f32.partialorder %v1927_v28, -1.0  ;;  %vm579_vm7 = vcmp.le.f32.partialorder %v1927_v28, 16.0  ;;  %v960_v28 = vld [vmem:[%s1859_s19 + $0xa8] sm:$0xff]  ;;  %p1525_p0 = por %p1524_p9, %p1523_p3 }
  0xa2   : > { %386 = vperm.xlu0 %1419, %v378_v55   ;;  %v696_v7 = vmax.f32 %v1966_v63, 0.0  ;;  %v697_v36 = vmax.f32 %v1986_v21, 0.0  ;;  %1246 = vmatpush3.msra.mxu0 %v949_v31  ;;  %vm688_vm3 = vcmp.ge.f32.partialorder %v1966_v63, -1.0  ;;  %vm690_vm4 = vcmp.le.f32.partialorder %v1966_v63, 16.0 }
  0xa3   : > { %v758_v11 = vmin.f32 %v756_v1, 15.0  ;;  %v759_v25 = vmin.f32 %v757_v16, 15.0  ;;  %1283 = vmatprep.subr.mxu1 %v966_v22  ;;  %1247 = vmatprep.subr.mxu0 %v964_v37  ;;  %v826_v52 = vmin.f32 %v824_v43, 15.0  ;;  %v1426_v53 = vpack.i.bf16 %v582_v47, %v511_v41  ;;  %vm2095_vm11 = vmand %vm688_vm3, %vm690_vm4  ;;  %p1526_p2 = pnand %p1525_p0, %p1519_p1 }
  0xa4   : > { %v698_v19 = vmin.f32 %v696_v7, 15.0  ;;  %1299 = vmatpush3.msra.mxu1 %v950_v23  ;;  %v699_v46 = vmin.f32 %v697_v36, 15.0  ;;  %1248 = vmatpush3.msra.mxu0 %v948_v38  ;;  %vm748_vm8 = vcmp.ge.f32.partialorder %v1961_v59, -1.0  ;;  %vm750_vm9 = vcmp.le.f32.partialorder %v1961_v59, 16.0  ;;  %v944_v59 = vld [vmem:[%s1859_s19 + $0x28] sm:$0xff]  ;;  %v941_v23 = vld [vmem:[%s1859_s19 + $0x10] sm:$0xff] }
  0xa5   : > { %762 = vperm.xlu1 %1420, %v758_v11   ;;  %1284 = vmatprep.subr.mxu1 %v965_v24  ;;  %v821_v55 = vsel %vm2046_vm15, 0.5, %v1634_v39  ;;  %v881_v56 = vsel %vm2056_vm2, 0.5, %v1634_v39  ;;  %vm368_vm13 = vcmp.ge.f32.partialorder %v1934_v32, -1.0  ;;  %vm370_vm14 = vcmp.le.f32.partialorder %v1934_v32, 16.0  ;;  %vm2111_vm15 = vmand %vm577_vm6, %vm579_vm7  ;;  %v943_v11 = vld [vmem:[%s1859_s19 + $0x20] sm:$0xff] }
  0xa6   : > { %524 = vperm.xlu0 %1419, %v516_v6   ;;  %1249 = vmatprep.subr.mxu0 %v963_v14  ;;  %v373_v57 = vsel %vm2032_vm12, 0.5, %v1634_v39  ;;  %v444_v58 = vsel %vm2067_vm5, 0.5, %v1634_v39  ;;  %vm816_vm0 = vcmp.ge.f32.partialorder %v1995_v29, -1.0  ;;  %vm818_vm1 = vcmp.le.f32.partialorder %v1995_v29, 16.0  ;;  %vm2122_vm12 = vmand %vm748_vm8, %vm750_vm9  ;;  %v955_v29 = vld [vmem:[%s1859_s19 + $0x80] sm:$0xff] }
  0xa7   : > { %1300 = vmatpush3.msra.mxu1 %v949_v31  ;;  %1250 = vmatpush3.msra.mxu0 %v947_v45  ;;  %vm876_vm2 = vcmp.ge.f32.partialorder %v1981_v17, -1.0  ;;  %vm878_vm3 = vcmp.le.f32.partialorder %v1981_v17, 16.0  ;;  %v1436_v63 = vpack.i.bf16 %v881_v56, %v821_v55  ;;  %vm2133_vm4 = vmand %vm368_vm13, %vm370_vm14  ;;  %vm439_vm5 = vcmp.ge.f32.partialorder %v1940_v35, -1.0  ;;  %v939_v31 = vld [vmem:[%s1859_s19] sm:$0xff] }
  0xa8   : > { %1285 = vmatprep.subr.mxu1 %v964_v37  ;;  %1251 = vmatprep.subr.mxu0 %v962_v49  ;;  %vm441_vm6 = vcmp.le.f32.partialorder %v1940_v35, 16.0  ;;  %v1421_v1 = vpack.i.bf16 %v444_v58, %v373_v57  ;;  %v512_v2 = vsel %vm2080_vm10, 0.5, %v1634_v39  ;;  %v583_v32 = vsel %vm2111_vm15, 0.5, %v1634_v39  ;;  %vm2150_vm7 = vmand %vm816_vm0, %vm818_vm1  ;;  %v958_v35 = vld [vmem:[%s1859_s19 + $0x98] sm:$0xff] }
  0xa9   : > { %889 = vperm.xlu1 %1420, %v885_v15   ;;  %1301 = vmatpush3.msra.mxu1 %v948_v38  ;;  %v694_v5 = vsel %vm2095_vm11, 0.5, %v1634_v39  ;;  %v754_v6 = vsel %vm2122_vm12, 0.5, %v1634_v39  ;;  %vm2164_vm8 = vmand %vm876_vm2, %vm878_vm3  ;;  %vm689_vm10 = vcmp.ge.f32.partialorder %v1986_v21, -1.0  ;;  %vm691_vm11 = vcmp.le.f32.partialorder %v1986_v21, 16.0  ;;  %v318_v38 = vld [vmem:[%s2402_s5] sm:$0x3] }
  0xaa   : > { %702 = vperm.xlu0 %1419, %v698_v19   ;;  %1252 = vmatpush3.msra.mxu0 %v946_v51  ;;  %vm2173_vm9 = vmand %vm439_vm5, %vm441_vm6  ;;  %v1446_v12 = vpack.i.bf16 %v583_v32, %v512_v2  ;;  %vm749_vm13 = vcmp.ge.f32.partialorder %v1971_v3, -1.0  ;;  %vm751_vm14 = vcmp.le.f32.partialorder %v1971_v3, 16.0  ;;  %v1431_v13 = vpack.i.bf16 %v754_v6, %v694_v5  ;;  %v942_v19 = vld [vmem:[%s1859_s19 + $0x18] sm:$0xff]  ;;  %v956_v3 = vld [vmem:[%s1859_s19 + $0x88] sm:$0xff] }
  0xab   : > { %1286 = vmatprep.subr.mxu1 %v963_v14  ;;  %1253 = vmatprep.subr.mxu0 %v961_v54  ;;  %v822_v15 = vsel %vm2150_vm7, 0.5, %v1634_v39  ;;  %v882_v16 = vsel %vm2164_vm8, 0.5, %v1634_v39  ;;  %v374_v17 = vsel %vm2133_vm4, 0.5, %v1634_v39  ;;  %v445_v18 = vsel %vm2173_vm9, 0.5, %v1634_v39  ;;  %vm693_vm15 = vmand %vm689_vm10, %vm691_vm11 }
  0xac   : > { %1302 = vmatpush3.msra.mxu1 %v947_v45  ;;  %1254 = vmatpush3.msra.mxu0 %v945_v61  ;;  %vm753_vm0 = vmand %vm749_vm13, %vm751_vm14  ;;  %v1456_v22 = vpack.i.bf16 %v882_v16, %v822_v15  ;;  %v1441_v24 = vpack.i.bf16 %v445_v18, %v374_v17  ;;  %v695_v21 = vsel %vm693_vm15, 0.5, %v1634_v39 }
  0xad   : > { %767 = vperm.xlu1 %1420, %v759_v25   ;;  %1287 = vmatprep.subr.mxu1 %v962_v49  ;;  %v755_v25 = vsel %vm753_vm0, 0.5, %v1634_v39 }
  0xae   : > { %829 = vperm.xlu0 %1419, %v825_v33   ;;  %1255 = vmatprep.subr.mxu0 %v960_v28  ;;  %v1451_v30 = vpack.i.bf16 %v755_v25, %v695_v21  ;;  %v390_v33 = vlaneseq }
  0xaf   : > { %1303 = vmatpush3.msra.mxu1 %v946_v51  ;;  %1256 = vmatpush3.msra.mxu0 %v944_v59 }
  0xb0   : > { %1288 = vmatprep.subr.mxu1 %v961_v54  ;;  %1257 = vmatprep.subr.mxu0 %v959_v9  ;;  %v391_v36 = vshrl.u32 %v390_v33, 7 }
  0xb1   : > { %894 = vperm.xlu1 %1420, %v886_v42   ;;  %1304 = vmatpush3.msra.mxu1 %v945_v61 }
  0xb2   : > { %707 = vperm.xlu0 %1419, %v699_v46   ;;  %1258 = vmatpush3.msra.mxu0 %v943_v11  ;;  %v392_v37 = vsub.s32 0, %v391_v36  ;;  %v396_v8 = vsub.s32 1, %v391_v36 }
  0xb3   : > { %1289 = vmatprep.subr.mxu1 %v960_v28  ;;  %1259 = vmatprep.subr.mxu0 %v958_v35 }
  0xb4   : > { %1305 = vmatpush3.msra.mxu1 %v944_v59  ;;  %1260 = vmatpush3.msra.mxu0 %v942_v19  ;;  %v2213_v39 = vrot.slane %v318_v38, %v392_v37  ;;  %v2215_v41 = vrot.slane %v318_v38, %v396_v8  ;;  %v2224_v49 = vrot.slane %v317_v44, %v392_v37 }
  0xb5   : > { %1427 = vperm.xlu1 %1420, %v1426_v53   ;;  %1290 = vmatprep.subr.mxu1 %v959_v9  ;;  %v2226_v50 = vrot.slane %v317_v44, %v396_v8 }
  0xb6   : > { %834 = vperm.xlu0 %1419, %v826_v52   ;;  %1261 = vmatprep.subr.mxu0 %v957_v20 }
  0xb7   : > { %1306 = vmatpush3.msra.mxu1 %v943_v11  ;;  %1262 = vmatpush3.msra.mxu0 %v941_v23 }
  0xb8   : > { %1291 = vmatprep.subr.mxu1 %v958_v35  ;;  %1263 = vmatprep.subr.mxu0 %v956_v3 }
  0xb9   : > { %1437 = vperm.xlu1 %1420, %v1436_v63   ;;  %1307 = vmatpush3.msra.mxu1 %v942_v19 }
  0xba   : > { %1422 = vperm.xlu0 %1419, %v1421_v1   ;;  %1264 = vmatpush3.msra.mxu0 %v940_v26 }
  0xbb   : > { %1292 = vmatprep.subr.mxu1 %v957_v20  ;;  %1265 = vmatprep.subr.mxu0 %v955_v29 }
  0xbc   : > { %1308 = vmatpush3.msra.mxu1 %v941_v23  ;;  %1266 = vmatpush3.msra.mxu0 %v939_v31 }
  0xbd   : > { %1447 = vperm.xlu1 %1420, %v1446_v12   ;;  %1293 = vmatprep.subr.mxu1 %v956_v3 }
  0xbe   : > { %1432 = vperm.xlu0 %1419, %v1431_v13   ;;  %1309 = vmatpush3.msra.mxu1 %v940_v26 }
  0xbf   : > { %1294 = vmatprep.subr.mxu1 %v955_v29 }
  0xc0   : > { %1310 = vmatpush3.msra.mxu1 %v939_v31 }
  0xc1   : > { %1457 = vperm.xlu1 %1420, %v1456_v22  }
  0xc2   : > { %1442 = vperm.xlu0 %1419, %v1441_v24  }
  0xc6   : > { %1452 = vperm.xlu0 %1419, %v1451_v30  }
 0x10c   : > { %v520_v14 = vpop.permute.xlu1 %519 }
 0x10d   : > { %v538_v42 = vsub.f32 %v520_v14, %v2213_v39  ;;  %v539_v43 = vsub.f32 %v520_v14, %v2215_v41 }
 0x10f   : > { %v542_v46 = vand.u32 2147483647, %v538_v42  ;;  %v543_v47 = vand.u32 2147483647, %v539_v43 }
 0x110   : > { %v591_v45 = vpop.permute.xlu1 %590 }
 0x111   : > { %v598_v27 = vsub.f32 %v591_v45, %v2213_v39  ;;  %v599_v48 = vsub.f32 %v591_v45, %v2215_v41  ;;  %v546_v53 = vsub.f32 1.0, %v542_v46  ;;  %v547_v34 = vsub.f32 1.0, %v543_v47 }
 0x113   : > { %v602_v51 = vand.u32 2147483647, %v598_v27  ;;  %v603_v52 = vand.u32 2147483647, %v599_v48  ;;  %v2232_v63 = vmax.f32 %v546_v53, 0.0  ;;  %v2234_v0 = vmax.f32 %v547_v34, 0.0 }
 0x115   : > { %v382_v54 = vpop.permute.xlu0 %381  ;;  %v606_v40 = vsub.f32 1.0, %v602_v51  ;;  %v607_v57 = vsub.f32 1.0, %v603_v52 }
 0x116   : > { %v400_v55 = vsub.f32 %v382_v54, %v2224_v49  ;;  %v401_v56 = vsub.f32 %v382_v54, %v2226_v50 }
 0x117   : > { %v458_v58 = vpop.permute.xlu1 %457  ;;  %v2238_v5 = vmax.f32 %v606_v40, 0.0  ;;  %v2240_v6 = vmax.f32 %v607_v57, 0.0 }
 0x118   : > { %v404_v60 = vand.u32 2147483647, %v400_v55  ;;  %v405_v61 = vand.u32 2147483647, %v401_v56  ;;  %v462_v62 = vsub.f32 %v458_v58, %v2224_v49  ;;  %v463_v28 = vsub.f32 %v458_v58, %v2226_v50 }
 0x119   : > { %v453_v59 = vpop.permute.xlu0 %452 }
 0x11a   : > { %v408_v1 = vsub.f32 1.0, %v404_v60  ;;  %v409_v2 = vsub.f32 1.0, %v405_v61  ;;  %v460_v32 = vsub.f32 %v453_v59, %v2224_v49  ;;  %v461_v4 = vsub.f32 %v453_v59, %v2226_v50 }
 0x11b   : > { %v466_v7 = vand.u32 2147483647, %v462_v62  ;;  %v467_v9 = vand.u32 2147483647, %v463_v28  ;;  %v596_v10 = vpop.permute.xlu1 %595 }
 0x11c   : > { %v2242_v11 = vmax.f32 %v408_v1, 0.0  ;;  %v2244_v12 = vmax.f32 %v409_v2, 0.0  ;;  %v464_v35 = vand.u32 2147483647, %v460_v32  ;;  %v465_v13 = vand.u32 2147483647, %v461_v4 }
 0x11d   : > { %v470_v15 = vsub.f32 1.0, %v466_v7  ;;  %v471_v16 = vsub.f32 1.0, %v467_v9  ;;  %v387_v17 = vpop.permute.xlu0 %386  ;;  %v600_v18 = vsub.f32 %v596_v10, %v2213_v39  ;;  %v601_v19 = vsub.f32 %v596_v10, %v2215_v41 }
 0x11e   : > { %v468_v20 = vsub.f32 1.0, %v464_v35  ;;  %v469_v22 = vsub.f32 1.0, %v465_v13  ;;  %v402_v23 = vsub.f32 %v387_v17, %v2224_v49  ;;  %v403_v24 = vsub.f32 %v387_v17, %v2226_v50 }
 0x11f   : > { %v2250_v21 = vmax.f32 %v470_v15, 0.0  ;;  %v2252_v25 = vmax.f32 %v471_v16, 0.0  ;;  %v604_v3 = vand.u32 2147483647, %v600_v18  ;;  %v605_v26 = vand.u32 2147483647, %v601_v19 }
 0x120   : > { %v2254_v29 = vmax.f32 %v468_v20, 0.0  ;;  %v2256_v30 = vmax.f32 %v469_v22, 0.0  ;;  %v406_v31 = vand.u32 2147483647, %v402_v23  ;;  %v407_v33 = vand.u32 2147483647, %v403_v24  ;;  %v763_v36 = vpop.permute.xlu1 %762 }
 0x121   : > { %v608_v37 = vsub.f32 1.0, %v604_v3  ;;  %v609_v8 = vsub.f32 1.0, %v605_v26  ;;  %v525_v38 = vpop.permute.xlu0 %524  ;;  %v770_v14 = vsub.f32 %v763_v36, %v2224_v49  ;;  %v771_v42 = vsub.f32 %v763_v36, %v2226_v50 }
 0x122   : > { %v410_v43 = vsub.f32 1.0, %v406_v31  ;;  %v411_v44 = vsub.f32 1.0, %v407_v33  ;;  %v540_v45 = vsub.f32 %v525_v38, %v2213_v39  ;;  %v541_v46 = vsub.f32 %v525_v38, %v2215_v41 }
 0x123   : > { %v2262_v47 = vmax.f32 %v608_v37, 0.0  ;;  %v2264_v27 = vmax.f32 %v609_v8, 0.0  ;;  %v774_v48 = vand.u32 2147483647, %v770_v14  ;;  %v775_v51 = vand.u32 2147483647, %v771_v42 }
 0x124   : > { %v2266_v52 = vmax.f32 %v410_v43, 0.0  ;;  %v2268_v53 = vmax.f32 %v411_v44, 0.0  ;;  %v544_v34 = vand.u32 2147483647, %v540_v45  ;;  %v545_v54 = vand.u32 2147483647, %v541_v46  ;;  %v890_v55 = vpop.permute.xlu1 %889 }
 0x125   : > { %v778_v56 = vsub.f32 1.0, %v774_v48  ;;  %v779_v40 = vsub.f32 1.0, %v775_v51  ;;  %v703_v57 = vpop.permute.xlu0 %702  ;;  %v897_v58 = vsub.f32 %v890_v55, %v2213_v39  ;;  %v898_v60 = vsub.f32 %v890_v55, %v2215_v41 }
 0x126   : > { %v548_v61 = vsub.f32 1.0, %v544_v34  ;;  %v549_v62 = vsub.f32 1.0, %v545_v54  ;;  %v710_v28 = vsub.f32 %v703_v57, %v2224_v49  ;;  %v711_v59 = vsub.f32 %v703_v57, %v2226_v50 }
 0x127   : > { %v2274_v1 = vmax.f32 %v778_v56, 0.0  ;;  %v2276_v2 = vmax.f32 %v779_v40, 0.0  ;;  %v901_v32 = vand.u32 2147483647, %v897_v58  ;;  %v902_v4 = vand.u32 2147483647, %v898_v60 }
 0x128   : > { %v2278_v7 = vmax.f32 %v548_v61, 0.0  ;;  %v2280_v9 = vmax.f32 %v549_v62, 0.0  ;;  %v714_v10 = vand.u32 2147483647, %v710_v28  ;;  %v715_v35 = vand.u32 2147483647, %v711_v59  ;;  %v768_v13 = vpop.permute.xlu1 %767 }
 0x129   : > { %v905_v15 = vsub.f32 1.0, %v901_v32  ;;  %v906_v16 = vsub.f32 1.0, %v902_v4  ;;  %v830_v17 = vpop.permute.xlu0 %829  ;;  %v772_v18 = vsub.f32 %v768_v13, %v2224_v49  ;;  %v773_v19 = vsub.f32 %v768_v13, %v2226_v50 }
 0x12a   : > { %v718_v20 = vsub.f32 1.0, %v714_v10  ;;  %v719_v22 = vsub.f32 1.0, %v715_v35  ;;  %v837_v23 = vsub.f32 %v830_v17, %v2213_v39  ;;  %v838_v24 = vsub.f32 %v830_v17, %v2215_v41 }
 0x12b   : > { %v909_v3 = vmax.f32 %v905_v15, 0.0  ;;  %v910_v26 = vmax.f32 %v906_v16, 0.0  ;;  %v776_v31 = vand.u32 2147483647, %v772_v18  ;;  %v777_v33 = vand.u32 2147483647, %v773_v19 }
 0x12c   : > { %v2286_v36 = vmax.f32 %v718_v20, 0.0  ;;  %v2288_v37 = vmax.f32 %v719_v22, 0.0  ;;  %v841_v8 = vand.u32 2147483647, %v837_v23  ;;  %v842_v38 = vand.u32 2147483647, %v838_v24  ;;  %v895_v14 = vpop.permute.xlu1 %894 }
 0x12d   : > { %v780_v42 = vsub.f32 1.0, %v776_v31  ;;  %v781_v43 = vsub.f32 1.0, %v777_v33  ;;  %v708_v44 = vpop.permute.xlu0 %707  ;;  %v899_v45 = vsub.f32 %v895_v14, %v2213_v39  ;;  %v900_v46 = vsub.f32 %v895_v14, %v2215_v41 }
 0x12e   : > { %v845_v48 = vsub.f32 1.0, %v841_v8  ;;  %v846_v51 = vsub.f32 1.0, %v842_v38  ;;  %v712_v34 = vsub.f32 %v708_v44, %v2224_v49  ;;  %v713_v54 = vsub.f32 %v708_v44, %v2226_v50 }
 0x12f   : > { %v2294_v55 = vmax.f32 %v780_v42, 0.0  ;;  %v2296_v56 = vmax.f32 %v781_v43, 0.0  ;;  %v903_v40 = vand.u32 2147483647, %v899_v45  ;;  %v904_v57 = vand.u32 2147483647, %v900_v46 }
 0x130   : > { %v849_v58 = vmax.f32 %v845_v48, 0.0  ;;  %v850_v60 = vmax.f32 %v846_v51, 0.0  ;;  %v716_v61 = vand.u32 2147483647, %v712_v34  ;;  %v717_v62 = vand.u32 2147483647, %v713_v54  ;;  %v1428_v28 = vpop.permute.xlu1 %1427 }
 0x131   : > { %v907_v59 = vsub.f32 1.0, %v903_v40  ;;  %v908_v32 = vsub.f32 1.0, %v904_v57  ;;  %v835_v4 = vpop.permute.xlu0 %834  ;;  %v1430_v10 = vunpack.i.h.bf16 %v1428_v28  ;;  %v1429_v35 = vunpack.i.l.bf16 %v1428_v28 }
 0x132   : > { %v720_v13 = vsub.f32 1.0, %v716_v61  ;;  %v721_v49 = vsub.f32 1.0, %v717_v62  ;;  %v839_v50 = vsub.f32 %v835_v4, %v2213_v39  ;;  %v840_v15 = vsub.f32 %v835_v4, %v2215_v41 }
 0x133   : > { %v2300_v16 = vmax.f32 %v907_v59, 0.0  ;;  %v2302_v17 = vmax.f32 %v908_v32, 0.0  ;;  %v624_v18 = vmul.f32 %v1430_v10, %v2238_v5  ;;  %v625_v19 = vmul.f32 %v1430_v10, %v2240_v6 }
 0x134   : > { %v2306_v20 = vmax.f32 %v720_v13, 0.0  ;;  %v2308_v22 = vmax.f32 %v721_v49, 0.0  ;;  %v843_v23 = vand.u32 2147483647, %v839_v50  ;;  %v844_v24 = vand.u32 2147483647, %v840_v15  ;;  %v1438_v31 = vpop.permute.xlu1 %1437 }
 0x135   : > { %v564_v33 = vmul.f32 %v1429_v35, %v2232_v63  ;;  %v565_v39 = vmul.f32 %v1429_v35, %v2234_v0  ;;  %v1423_v41 = vpop.permute.xlu0 %1422  ;;  %v1440_v8 = vunpack.i.h.bf16 %v1438_v31  ;;  %v1439_v38 = vunpack.i.l.bf16 %v1438_v31 }
 0x136   : > { %v847_v14 = vsub.f32 1.0, %v843_v23  ;;  %v848_v42 = vsub.f32 1.0, %v844_v24  ;;  %v1425_v43 = vunpack.i.h.bf16 %v1423_v41  ;;  %v1424_v5 = vunpack.i.l.bf16 %v1423_v41 }
 0x137   : > { %v628_v44 = vadd.f32 %v624_v18, %v564_v33  ;;  %v923_v6 = vmul.f32 %v1440_v8, %v909_v3  ;;  %v924_v45 = vmul.f32 %v1440_v8, %v910_v26  ;;  %v863_v46 = vmul.f32 %v1439_v38, %v849_v58 }
 0x138   : > { %v851_v48 = vmax.f32 %v847_v14, 0.0  ;;  %v852_v51 = vmax.f32 %v848_v42, 0.0  ;;  %v486_v34 = vmul.f32 %v1425_v43, %v2254_v29  ;;  %v487_v54 = vmul.f32 %v1425_v43, %v2256_v30  ;;  %v1448_v63 = vpop.permute.xlu1 %1447 }
 0x139   : > { %v426_v0 = vmul.f32 %v1424_v5, %v2242_v11  ;;  %v427_v40 = vmul.f32 %v1424_v5, %v2244_v12  ;;  %v864_v57 = vmul.f32 %v1439_v38, %v850_v60  ;;  %v927_v61 = vadd.f32 %v923_v6, %v863_v46  ;;  %v1433_v62 = vpop.permute.xlu0 %1432 }
 0x13a   : > { %v1435_v28 = vunpack.i.h.bf16 %v1433_v62  ;;  %v1434_v59 = vunpack.i.l.bf16 %v1433_v62  ;;  %v1450_v32 = vunpack.i.h.bf16 %v1448_v63  ;;  %v1449_v3 = vunpack.i.l.bf16 %v1448_v63 }
 0x13b   : > { %v490_v26 = vadd.f32 %v486_v34, %v426_v0  ;;  %v491_v58 = vadd.f32 %v487_v54, %v427_v40  ;;  %v629_v4 = vadd.f32 %v625_v19, %v565_v39  ;;  %v928_v10 = vadd.f32 %v924_v45, %v864_v57 }
 0x13c   : > { %v796_v29 = vmul.f32 %v1435_v28, %v2274_v1  ;;  %v797_v30 = vmul.f32 %v1435_v28, %v2276_v2  ;;  %v736_v35 = vmul.f32 %v1434_v59, %v2286_v36  ;;  %v737_v11 = vmul.f32 %v1434_v59, %v2288_v37  ;;  %v1458_v12 = vpop.permute.xlu1 %1457 }
 0x13d   : > { %v626_v60 = vmul.f32 %v1450_v32, %v2262_v47  ;;  %v627_v13 = vmul.f32 %v1450_v32, %v2264_v27  ;;  %v566_v49 = vmul.f32 %v1449_v3, %v2278_v7  ;;  %v567_v50 = vmul.f32 %v1449_v3, %v2280_v9  ;;  %v1443_v15 = vpop.permute.xlu0 %1442 }
 0x13e   : > { %v800_v18 = vadd.f32 %v796_v29, %v736_v35  ;;  %v1445_v19 = vunpack.i.h.bf16 %v1443_v15  ;;  %v1444_v23 = vunpack.i.l.bf16 %v1443_v15  ;;  %v633_v1 = vmul.f32 %v629_v4, %v491_v58 }
 0x13f   : > { %v630_v24 = vadd.f32 %v626_v60, %v566_v49  ;;  %v631_v2 = vadd.f32 %v627_v13, %v567_v50  ;;  %v632_v31 = vmul.f32 %v628_v44, %v490_v26  ;;  %v1460_v36 = vunpack.i.h.bf16 %v1458_v12 }
 0x140   : > { %v488_v37 = vmul.f32 %v1445_v19, %v2250_v21  ;;  %v489_v33 = vmul.f32 %v1445_v19, %v2252_v25  ;;  %v428_v47 = vmul.f32 %v1444_v23, %v2266_v52  ;;  %v429_v27 = vmul.f32 %v1444_v23, %v2268_v53  ;;  %1043 = vmatprep.mubr.f32.mxu0 %v633_v1 }
 0x141   : > { %1044 = vmatmul.mubr.f32.vlgmr.msra.gmra.mxu0 %v632_v31  ;;  %v925_v7 = vmul.f32 %v1460_v36, %v2300_v16  ;;  %v926_v9 = vmul.f32 %v1460_v36, %v2302_v17  ;;  %v1459_v39 = vunpack.i.l.bf16 %v1458_v12  ;;  %v1453_v41 = vpop.permute.xlu0 %1452  ;;  %v801_v8 = vadd.f32 %v797_v30, %v737_v11 }
 0x142   : > { %v492_v38 = vadd.f32 %v488_v37, %v428_v47  ;;  %v493_v14 = vadd.f32 %v489_v33, %v429_v27  ;;  %v1455_v42 = vunpack.i.h.bf16 %v1453_v41  ;;  %v1454_v43 = vunpack.i.l.bf16 %v1453_v41 }
 0x143   : > { %v865_v21 = vmul.f32 %v1459_v39, %v851_v48  ;;  %v866_v5 = vmul.f32 %v1459_v39, %v852_v51  ;;  %v932_v25 = vmul.f32 %v928_v10, %v801_v8  ;;  %v931_v44 = vmul.f32 %v927_v61, %v800_v18 }
 0x144   : > { %v798_v52 = vmul.f32 %v1455_v42, %v2294_v55  ;;  %v799_v53 = vmul.f32 %v1455_v42, %v2296_v56  ;;  %v738_v6 = vmul.f32 %v1454_v43, %v2306_v20  ;;  %v739_v16 = vmul.f32 %v1454_v43, %v2308_v22 }
 0x145   : > { %v929_v17 = vadd.f32 %v925_v7, %v865_v21  ;;  %v930_v45 = vadd.f32 %v926_v9, %v866_v5  ;;  %1053 = vmatprep.mubr.f32.mxu1 %v932_v25  ;;  %v635_v46 = vmul.f32 %v631_v2, %v493_v14  ;;  %v634_v34 = vmul.f32 %v630_v24, %v492_v38 }
 0x146   : > { %v802_v54 = vadd.f32 %v798_v52, %v738_v6  ;;  %v803_v63 = vadd.f32 %v799_v53, %v739_v16  ;;  %1054 = vmatmul.mubr.f32.vlgmr.msra.gmra.mxu1 %v931_v44 }
 0x147   : > { %1048 = vmatprep.mubr.f32.mxu0 %v635_v46 }
 0x148   : > { %1049 = vmatmul.mubr.f32.gmra.mxu0 %v634_v34  ;;  %v934_v48 = vmul.f32 %v930_v45, %v803_v63  ;;  %v933_v51 = vmul.f32 %v929_v17, %v802_v54 }
 0x14a   : > { %1058 = vmatprep.mubr.f32.mxu1 %v934_v48 }
 0x14b   : > { %1059 = vmatmul.mubr.f32.gmra.mxu1 %v933_v51 }
 0x201   : > { %v1267_v55 = vpop.f32.mrf.mxu0 }
 0x203   : > { %v1268_v56 = vpop.f32.mrf.mxu0 }
 0x204   : > { %v1269_v20 = vadd.f32 %v1268_v56, %v1267_v55 }
 0x206   : > { %1064 = vst [vmem:[%s310_s27] sm:$0xff] %v1269_v20  ;;  %v1273_v22 = vpop.f32.mrf.mxu1 }
 0x208   : > { %v1274_v0 = vpop.f32.mrf.mxu1  ;;  %v1270_v40 = vpop.f32.mrf.mxu0 }
 0x209   : > { %v1275_v57 = vadd.f32 %v1274_v0, %v1273_v22 }
 0x20a   : > { %v1271_v61 = vpop.f32.mrf.mxu0 }
 0x20b   : > { %1066 = vst [vmem:[%s310_s27 + $0x10] sm:$0xff] %v1275_v57  ;;  %v1272_v62 = vadd.f32 %v1271_v61, %v1270_v40  ;;  %v1276_v28 = vpop.f32.mrf.mxu1 }
 0x20d   : > { %1065 = vst [vmem:[%s310_s27 + $0x8] sm:$0xff] %v1272_v62  ;;  %v1277_v59 = vpop.f32.mrf.mxu1 }
 0x20e   : > { %v1278_v32 = vadd.f32 %v1277_v59, %v1276_v28 }
 0x210   : > { %1067 = vst [vmem:[%s310_s27 + $0x18] sm:$0xff] %v1278_v32 }
 0x211   : > { %1529 = shalt.err (!%p1526_p2)
}
 0x212   : > { %s1530_s8 = scalar_lea.hbm %s2341_s10, 512  ;;  %s1534_s6 = scalar_lea.hbm %s2481_s20, 1536 }
 0x213   : > { %p1531_p11 = scmp.ne.s32.totalorder %s2341_s10, %s1530_s8  ;;  %p1535_p6 = scmp.lt.s32.totalorder %s2341_s10, %s2481_s20 }
 0x214   : > { %p1536_p13 = scmp.lt.s32.totalorder %s1534_s6, %s1530_s8 }
 0x215   : > { %p1532_p4 = pnand %p1531_p11, %p2482_p5 }
 0x216   : > { %p1537_p7 = por %p1536_p13, %p1535_p6 }
 0x217   : > { %p1533_p8 = pneg %p1532_p4 }
 0x219   : > { %p1538_p10 = pnand %p1537_p7, %p1533_p8 }
 0x21b   : > { %1541 = shalt.err (!%p1538_p10)
}
 0x21c   : > { %s1636_s23 = smov 128   ;;  %s1637_s21 = smov 8  }
 0x21d   : > { %1319 = dma.vmem_to_hbm [thread:$0]  (%p2482_p5), %s2336_s1, 512, %s2341_s10, %s2343_s30, %s1636_s23, %s1636_s23, %s1637_s21  }
 0x21e PF: > { %s2483_s17 = sld [smem:[#allocation22_spill]] }
 0x21f   : > { %s2484_s19 = sld [smem:[#allocation17_spill]] }
 0x220   : > { %s2485_s18 = sld [smem:[#allocation24_spill]] }
 0x224   : > { %p1338_p12 = scmp.ge.s32.totalorder %s2483_s17, 2 }
 0x225   : > { %s1099_s15 = sand.u32 1, %s2484_s19  }
 0x226   : > { %p2486_p1 = scmp.ne.s32.totalorder %s2485_s18, 0  ;;  %s1100_s24 = scalar_lea.sflag [#allocation7], %s1099_s15 }
 0x228   : > { %p1332_p3 = pnand %p1338_p12, %p2486_p1 }
 0x22a   : > { %p1333_p9 = pneg %p1332_p3 }
 0x22c   : > { %1589 = dma.done.wait (%p1333_p9), %s1100_s24, 512  }
 0x22d   : > { %1591 = vsyncadd (%p1333_p9), %s1100_s24, 4294966784  ;;  %s30_s13 = sadd.s32 1, %s2483_s17   ;;  %s2487_s27 = sld [smem:[#allocation18_spill]] }
 0x22e   : > { %p27_p0 = scmp.ge.s32.totalorder %s30_s13, 5   ;;  %s2488_s30 = sld [smem:[#allocation26_spill]] }
 0x22f   : > { %s2489_s8 = sld [smem:[#allocation19_spill]]  ;;  %s2494_s29 = smov %s1598_s0 }
 0x230   : > { %s2490_s9 = sld [smem:[#allocation20_spill]]  ;;  %29 = sbr.rel (!%p27_p0) target bundleno = 25 (0x19), region = 94 }
 0x231   : > { %s2491_s10 = sld [smem:[#allocation27_spill]] }
 0x232   : > { %s2492_s11 = sld [smem:[#allocation21_spill]] }
 0x233   : > { %s2493_s12 = sld [smem:[#allocation25_spill]]  ;;  %s2495_s0 = smov %s2487_s27 }
 0x235   :  { %1105 = vsyncpa [#allocation6], 1 }
 0x236   :  { %1107 = vsyncpa [#allocation6 + $0x1], 1 }
 0x237   :  { %1108 = vsyncpa [#allocation7], 1 }
 0x238   :  { %1110 = vsyncpa [#allocation7 + $0x1], 1 }
 0x239   :  { %1111 = vsyncpa [#allocation8], 1 }
 0x23a   :  { %1113 = vsyncpa [#allocation8 + $0x1], 1 }

</bundles_post_ra>
